<compile_context>
chip_gen: v5e
topology: v5e:2x2
jax: 0.10.0
libtpu: 0.0.40
codegen_flags: <defaults>
</compile_context>

<pallas_src>
import functools

import jax
import jax.numpy as jnp
from jax.experimental import pallas as pl
from jax.experimental.pallas import tpu as pltpu


# ------------------------------ small helpers ------------------------------ #

def _round_up(x, m):
    return (x + m - 1) // m * m


def _pad_last(a, to):
    pad = [(0, 0)] * a.ndim
    pad[-1] = (0, to - a.shape[-1])
    return jnp.pad(a, pad)


def _pad1(v, cp):
    v = jnp.asarray(v, jnp.float32).reshape(-1)
    return jnp.pad(v, (0, cp - v.shape[0]))


@functools.lru_cache(maxsize=None)
def _vmem_cap_bytes():
    """Generation-aware VMEM cap: ~48 MiB on v7x (64 MiB/TC), ~96 MiB v5e/v6e."""
    phys = 64 << 20
    try:
        info = pltpu.get_tpu_info()
        phys = int(getattr(info, "vmem_capacity_bytes", phys))
    except Exception:
        pass
    return int(min(phys - (16 << 20), 96 << 20))


def _compiler_params(block_bytes):
    # vmem_limit derived from the actual per-step block bytes (+ pipeline
    # margin), capped below the physical per-core VMEM of this generation.
    vmem = int(min(_vmem_cap_bytes(), max(4 * block_bytes + (8 << 20), 16 << 20)))
    return pltpu.CompilerParams(dimension_semantics=("parallel",),
                                vmem_limit_bytes=vmem)


def _pick_bblk(n, ho, wo, target_rows):
    """Images per grid step: keep the per-step M tile near `target_rows` while
    leaving grid = n // b_blk >= 2 so the 'parallel' axis can split across the
    two v7x TensorCores (single-core v5e/v6e are unaffected)."""
    best = 1
    for b in range(1, n + 1):
        if n % b:
            continue
        if b * ho * wo > max(target_rows, ho * wo):
            continue
        if n >= 2 and n // b < 2:
            continue
        best = b
    return best


def _col_sum_sq(acc_ref, mt, cp, chunk=128):
    """Per-channel sum / sum-of-squares of an (mt, cp) f32 scratch ref, reduced
    in row chunks so y and y*y never sit fully live in vregs."""
    s = jnp.zeros((1, cp), jnp.float32)
    q = jnp.zeros((1, cp), jnp.float32)
    for r0 in range(0, mt, chunk):
        r1 = min(r0 + chunk, mt)
        blk = acc_ref[r0:r1, :]
        s = s + jnp.sum(blk, axis=0, keepdims=True)
        q = q + jnp.sum(blk * blk, axis=0, keepdims=True)
    return s, q


def _build_tap_views(x_nhwc, stride):
    """3x3 / pad-1 conv taps without materializing im2col in HBM.

    Returns (phases, tap_plan, ho, wo).  `phases` together hold ~1x the
    spatially padded input; the input window of tap (kh, kw) is
    phases[p][:, r0:r0+ho, c0:c0+wo, :] with (p, r0, c0) = tap_plan[kh*3+kw],
    a contiguous static slice (so the 9 shifted matmuls stay in-kernel).
    """
    n, h, w, c = x_nhwc.shape
    ho = (h + 2 - 3) // stride + 1
    wo = (w + 2 - 3) // stride + 1
    xp = jnp.pad(x_nhwc, ((0, 0), (1, 1), (1, 1), (0, 0)))
    if stride == 1:
        phases = [xp]
        plan = [(0, kh, kw) for kh in range(3) for kw in range(3)]
    else:
        s = stride
        phases, idx = [], {}
        for a in range(s):
            for b in range(s):
                idx[(a, b)] = len(phases)
                phases.append(xp[:, a::s, b::s, :])
        plan = [(idx[(kh % s, kw % s)], kh // s, kw // s)
                for kh in range(3) for kw in range(3)]
    need_r, need_c = {}, {}
    for (p, r0, c0) in plan:
        need_r[p] = max(need_r.get(p, 0), r0 + ho)
        need_c[p] = max(need_c.get(p, 0), c0 + wo)
    for p, ph in enumerate(phases):
        if p in need_r:
            assert ph.shape[1] >= need_r[p] and ph.shape[2] >= need_c[p], (
                "phase view too small for its tap window")
    return phases, plan, ho, wo


# --------------------------- Pallas kernel passes --------------------------- #

def conv1_pass1(phases, w1, tap_plan, *, b_blk, ho, wo, cp, store_dtype):
    """Fused-im2col 3x3 conv (stride via phase views) + per-block BN stats."""
    n, cin = phases[0].shape[0], phases[0].shape[-1]
    mt = b_blk * ho * wo
    m = n * ho * wo
    grid = (n // b_blk,)
    n_ph = len(phases)
    itm = jnp.dtype(store_dtype).itemsize

    def kernel(*refs):
        phase_refs = refs[:n_ph]
        w_ref = refs[n_ph]
        y_ref, st_ref, acc_ref = refs[n_ph + 1], refs[n_ph + 2], refs[n_ph + 3]
        for t, (p, r0, c0) in enumerate(tap_plan):
            xt = phase_refs[p][:, r0:r0 + ho, c0:c0 + wo, :]
            contrib = jnp.dot(xt.reshape(mt, cin), w_ref[t],
                              preferred_element_type=jnp.float32)
            if t == 0:
                acc_ref[...] = contrib
            else:
                acc_ref[...] += contrib
        y_ref[...] = acc_ref[...].astype(y_ref.dtype)
        s, q = _col_sum_sq(acc_ref, mt, cp)
        st_ref[0] = jnp.concatenate([s, q], axis=0)

    in_specs = [pl.BlockSpec((b_blk,) + ph.shape[1:], lambda i: (i, 0, 0, 0))
                for ph in phases]
    in_specs.append(pl.BlockSpec(w1.shape, lambda i: (0, 0, 0)))

    block_bytes = (sum(b_blk * ph.shape[1] * ph.shape[2] * cin for ph in phases)
                   * itm + w1.size * itm
                   + mt * cp * itm + 2 * cp * 4 + mt * cp * 4)

    y, st = pl.pallas_call(
        kernel,
        out_shape=(jax.ShapeDtypeStruct((m, cp), store_dtype),
                   jax.ShapeDtypeStruct((grid[0], 2, cp), jnp.float32)),
        grid=grid,
        in_specs=in_specs,
        out_specs=(pl.BlockSpec((mt, cp), lambda i: (i, 0)),
                   pl.BlockSpec((1, 2, cp), lambda i: (i, 0, 0))),
        scratch_shapes=[pltpu.VMEM((mt, cp), jnp.float32)],
        compiler_params=_compiler_params(block_bytes),
    )(*phases, w1)
    return y, jnp.sum(st, axis=0)


def conv2_pass1(y1, ab1, w2, xs, ws, *, b_blk, ho, wo, cp, store_dtype):
    """3x3 / stride-1 conv over conv1's pre-BN output with:
       * conv1's BN scale/shift + ReLU folded onto the loaded tile,
       * spatial zero-padding rebuilt in a VMEM scratch (no padded HBM copy),
       * the option-'B' 1x1 projection shortcut + its BN stats fused in.
    """
    m = y1.shape[0]
    mt = b_blk * ho * wo
    grid = (m // mt,)
    has_proj = xs is not None
    n_stats = 4 if has_proj else 2
    itm = jnp.dtype(store_dtype).itemsize
    hp, wp = ho + 2, wo + 2

    # Row-chunking of the BN1 + ReLU prologue (bounds vreg pressure).
    rh = 1
    for cand in range(ho, 0, -1):
        if ho % cand == 0 and cand * wo <= 128:
            rh = cand
            break

    def kernel(*refs):
        y1_ref, ab1_ref, w2_ref = refs[0], refs[1], refs[2]
        nin = 3
        if has_proj:
            xs_ref, ws_ref = refs[3], refs[4]
            nin = 5
        if has_proj:
            y2_ref, ys_ref, st_ref, acc_ref, apad_ref = refs[nin:]
        else:
            y2_ref, st_ref, acc_ref, apad_ref = refs[nin:]

        # conv1 BN + ReLU applied on load; zero spatial border kept in VMEM.
        # (Zeroed every step: with a 'parallel' grid split across cores, a
        # program_id==0 guard would leave the second core's scratch undefined.)
        apad_ref[...] = jnp.zeros_like(apad_ref)
        scale1 = ab1_ref[0:1, :]
        shift1 = ab1_ref[1:2, :]
        for b in range(b_blk):
            for h0 in range(0, ho, rh):
                r0 = b * ho * wo + h0 * wo
                a = y1_ref[r0:r0 + rh * wo, :].astype(jnp.float32)
                a = jnp.maximum(a * scale1 + shift1, 0.0)
                apad_ref[b, 1 + h0:1 + h0 + rh, 1:1 + wo, :] = (
                    a.astype(apad_ref.dtype).reshape(rh, wo, cp))

        # 9 shifted matmuls (fused im2col) into the f32 accumulator.
        for t in range(9):
            kh, kw = t // 3, t % 3
            xt = apad_ref[:, kh:kh + ho, kw:kw + wo, :]
            contrib = jnp.dot(xt.reshape(mt, cp), w2_ref[t],
                              preferred_element_type=jnp.float32)
            if t == 0:
                acc_ref[...] = contrib
            else:
                acc_ref[...] += contrib
        y2_ref[...] = acc_ref[...].astype(y2_ref.dtype)
        s2, q2 = _col_sum_sq(acc_ref, mt, cp)

        if has_proj:
            # 1x1 projection shortcut on the natural (un-padded) Cin width.
            acc_ref[...] = jnp.dot(xs_ref[...], ws_ref[...],
                                   preferred_element_type=jnp.float32)
            ys_ref[...] = acc_ref[...].astype(ys_ref.dtype)
            ss, qs = _col_sum_sq(acc_ref, mt, cp)
            st_ref[0] = jnp.concatenate([s2, q2, ss, qs], axis=0)
        else:
            st_ref[0] = jnp.concatenate([s2, q2], axis=0)

    in_specs = [pl.BlockSpec((mt, cp), lambda i: (i, 0)),
                pl.BlockSpec((2, cp), lambda i: (0, 0)),
                pl.BlockSpec(w2.shape, lambda i: (0, 0, 0))]
    args = [y1, ab1, w2]
    block_bytes = mt * cp * itm + 2 * cp * 4 + w2.size * itm
    if has_proj:
        cin_s = xs.shape[1]
        in_specs += [pl.BlockSpec((mt, cin_s), lambda i: (i, 0)),
                     pl.BlockSpec(ws.shape, lambda i: (0, 0))]
        args += [xs, ws]
        block_bytes += mt * cin_s * itm + ws.size * itm

    out_shape = [jax.ShapeDtypeStruct((m, cp), store_dtype)]
    out_specs = [pl.BlockSpec((mt, cp), lambda i: (i, 0))]
    if has_proj:
        out_shape.append(jax.ShapeDtypeStruct((m, cp), store_dtype))
        out_specs.append(pl.BlockSpec((mt, cp), lambda i: (i, 0)))
    out_shape.append(jax.ShapeDtypeStruct((grid[0], n_stats, cp), jnp.float32))
    out_specs.append(pl.BlockSpec((1, n_stats, cp), lambda i: (i, 0, 0)))
    block_bytes += (len(out_shape) - 1) * mt * cp * itm + n_stats * cp * 4
    block_bytes += mt * cp * 4 + b_blk * hp * wp * cp * itm        # scratch

    outs = pl.pallas_call(
        kernel,
        out_shape=tuple(out_shape),
        grid=grid,
        in_specs=in_specs,
        out_specs=tuple(out_specs),
        scratch_shapes=[pltpu.VMEM((mt, cp), jnp.float32),
                        pltpu.VMEM((b_blk, hp, wp, cp), store_dtype)],
        compiler_params=_compiler_params(block_bytes),
    )(*args)
    st = jnp.sum(outs[-1], axis=0)
    return (*outs[:-1], st)


def bn_add_act(y2, res, ab, *, mt, planes, out_dtype, apply_relu):
    """out = scale2*y2 + shift2 + scale_r*res + shift_r [+ ReLU].

    Output is written at the true `planes` lane width (no XLA slice pass).
    """
    # TODO(synk): add pipeline_mode=pl.Buffered(3) on the y2/res specs if xprof
    # shows exposed DMA on this pure-bandwidth pass.
    m, cp = y2.shape
    grid = (m // mt,)
    rw = res.shape[1]

    def kernel(y_ref, r_ref, ab_ref, o_ref):
        out = y_ref[...].astype(jnp.float32) * ab_ref[0:1, :] + ab_ref[1:2, :]
        res_t = (r_ref[...].astype(jnp.float32)[:, :planes]
                 * ab_ref[2:3, :planes] + ab_ref[3:4, :planes])
        out = out[:, :planes] + res_t
        if apply_relu:
            out = jnp.maximum(out, 0.0)
        o_ref[...] = out.astype(o_ref.dtype)

    block_bytes = (mt * cp * y2.dtype.itemsize + mt * rw * res.dtype.itemsize
                   + 4 * cp * 4 + mt * planes * jnp.dtype(out_dtype).itemsize)
    return pl.pallas_call(
        kernel,
        out_shape=jax.ShapeDtypeStruct((m, planes), out_dtype),
        grid=grid,
        in_specs=[pl.BlockSpec((mt, cp), lambda i: (i, 0)),
                  pl.BlockSpec((mt, rw), lambda i: (i, 0)),
                  pl.BlockSpec((4, cp), lambda i: (0, 0))],
        out_specs=pl.BlockSpec((mt, planes), lambda i: (i, 0)),
        compiler_params=_compiler_params(block_bytes),
    )(y2, res, ab)


# ------------------------------- JAX glue ---------------------------------- #

def _bn_scale_shift(stats, m_true, gamma, beta, cp, eps):
    """Per-channel scale/shift from accumulated sum / sumsq (f32, tiny)."""
    mean = stats[0] / m_true
    var = jnp.maximum(stats[1] / m_true - mean * mean, 0.0)
    # TODO(synk): E[y^2]-E[y]^2 can cancel if activations develop large means;
    # switch to a shifted two-pass variance if that ever matters.
    scale = _pad1(gamma, cp) * jax.lax.rsqrt(var + eps)
    shift = _pad1(beta, cp) - mean * scale
    return scale, shift


def basic_block_forward(x_nchw, params, *, stride, planes, relu_output=True,
                        eps=1e-5, compute_dtype=jnp.bfloat16,
                        out_dtype=jnp.float32, target_rows=512):
    """Pallas-backed BasicBlock forward (option 'B' shortcut)."""
    # TODO(synk): when blocks are chained, keep activations NHWC (and bf16)
    # between blocks to drop the per-block NCHW<->NHWC transposes.
    x = jnp.transpose(x_nchw, (0, 2, 3, 1))                       # NHWC
    n, h, w, cin = x.shape
    cp = _round_up(planes, 128)          # lane-dense padded output channels
    store_dtype = jnp.dtype(compute_dtype)
    xc = x.astype(store_dtype)

    # ---- conv1 (3x3, stride s): fused-im2col matmuls + BN statistics -------
    phases, tap_plan, ho, wo = _build_tap_views(xc, stride)
    m = n * ho * wo
    b_blk = _pick_bblk(n, ho, wo, target_rows)
    mt = b_blk * ho * wo
    assert mt % 8 == 0 and wo % 8 == 0, (
        "tiling assumes CIFAR-style spatial dims (Wo and the per-step row "
        "tile must be multiples of 8)")

    w1 = _pad_last(params['w1'].reshape(9, cin, planes), cp).astype(store_dtype)
    y1, st1 = conv1_pass1(phases, w1, tap_plan, b_blk=b_blk, ho=ho, wo=wo,
                          cp=cp, store_dtype=store_dtype)
    s1, b1 = _bn_scale_shift(st1, m, params['g1'], params['b1'], cp, eps)
    ab1 = jnp.stack([s1, b1]).astype(jnp.float32)

    # ---- conv2 (3x3, stride 1) with conv1's BN/ReLU folded onto its input
    # ---- and the option-'B' 1x1 projection shortcut fused in ---------------
    w2 = params['w2'].reshape(9, planes, planes)
    w2 = jnp.pad(w2, ((0, 0), (0, cp - planes), (0, cp - planes))).astype(store_dtype)

    use_proj = (stride != 1) or (cin != planes)
    if use_proj:
        xs = xc[:, ::stride, ::stride, :][:, :ho, :wo, :].reshape(m, cin)
        ws = _pad_last(params['ws'], cp).astype(store_dtype)
        y2, ys, st = conv2_pass1(y1, ab1, w2, xs, ws, b_blk=b_blk, ho=ho,
                                 wo=wo, cp=cp, store_dtype=store_dtype)
        s2, b2 = _bn_scale_shift(st[0:2], m, params['g2'], params['b2'], cp, eps)
        ss, bs = _bn_scale_shift(st[2:4], m, params['gs'], params['bs'], cp, eps)
        ab = jnp.stack([s2, b2, ss, bs]).astype(jnp.float32)
        residual = ys
    else:
        y2, st = conv2_pass1(y1, ab1, w2, None, None, b_blk=b_blk, ho=ho,
                             wo=wo, cp=cp, store_dtype=store_dtype)
        s2, b2 = _bn_scale_shift(st, m, params['g2'], params['b2'], cp, eps)
        ab = jnp.stack([s2, b2,
                        jnp.ones((cp,), jnp.float32),
                        jnp.zeros((cp,), jnp.float32)])
        residual = xc.reshape(m, cin)       # identity shortcut, natural width

    # ---- bn2 + shortcut-bn / identity + residual add (+ ReLU) --------------
    out = bn_add_act(y2, residual, ab, mt=mt, planes=planes,
                     out_dtype=out_dtype, apply_relu=relu_output)
    out = out.reshape(n, ho, wo, planes)
    return jnp.transpose(out, (0, 3, 1, 2))                       # NCHW


# --------------------------- pure-JAX reference ----------------------------- #

def reference_forward(x, params, *, stride, planes, relu_output=True, eps=1e-5):
    def conv(x, w_hwio, s, pad):
        return jax.lax.conv_general_dilated(
            x, w_hwio, (s, s), ((pad, pad), (pad, pad)),
            dimension_numbers=('NCHW', 'HWIO', 'NCHW'),
            precision=jax.lax.Precision.HIGHEST)

    def bn(y, g, b):
        mean = jnp.mean(y, axis=(0, 2, 3), keepdims=True)
        var = jnp.mean(jnp.square(y - mean), axis=(0, 2, 3), keepdims=True)
        return ((y - mean) * jax.lax.rsqrt(var + eps)
                * g.reshape(1, -1, 1, 1) + b.reshape(1, -1, 1, 1))

    out = jax.nn.relu(bn(conv(x, params['w1'], stride, 1),
                         params['g1'][0], params['b1'][0]))
    out = bn(conv(out, params['w2'], 1, 1), params['g2'][0], params['b2'][0])
    cin = x.shape[1]
    if stride != 1 or cin != planes:
        ws = params['ws'].reshape(1, 1, cin, planes)
        sc = bn(conv(x, ws, stride, 0), params['gs'][0], params['bs'][0])
    else:
        sc = x
    out = out + sc
    if relu_output:
        out = jax.nn.relu(out)
    return out


# ---------------------------------- main ------------------------------------ #

if __name__ == "__main__":
    N, IN_PLANES, PLANES, H, W, STRIDE = 2, 4, 8, 16, 16, 2

    key = jax.random.PRNGKey(0)
    k = jax.random.split(key, 8)

    params = {
        # conv weights stored in HWIO layout (kh, kw, Cin, Cout)
        'w1': 0.1 * jax.random.normal(k[0], (3, 3, IN_PLANES, PLANES), jnp.float32),
        'w2': 0.1 * jax.random.normal(k[1], (3, 3, PLANES, PLANES), jnp.float32),
        'ws': 0.1 * jax.random.normal(k[2], (IN_PLANES, PLANES), jnp.float32),
        # BN affine params, stored (1, C)
        'g1': 1.0 + 0.1 * jax.random.normal(k[3], (1, PLANES), jnp.float32),
        'b1': 0.1 * jax.random.normal(k[4], (1, PLANES), jnp.float32),
        'g2': 1.0 + 0.1 * jax.random.normal(k[5], (1, PLANES), jnp.float32),
        'b2': 0.1 * jax.random.normal(k[6], (1, PLANES), jnp.float32),
        'gs': jnp.ones((1, PLANES), jnp.float32),
        'bs': jnp.zeros((1, PLANES), jnp.float32),
    }

    x = jax.random.normal(k[7], (N, IN_PLANES, H, W), jnp.float32)

    ref = jax.block_until_ready(
        reference_forward(x, params, stride=STRIDE, planes=PLANES,
                          relu_output=True))

    # f32 compute path — tight check (grid of 2 exercises the cross-block BN
    # statistics and the fused option-'B' projection shortcut).
    fwd_f32 = jax.jit(functools.partial(
        basic_block_forward, stride=STRIDE, planes=PLANES, relu_output=True,
        compute_dtype=jnp.float32))
    out_f32 = jax.block_until_ready(fwd_f32(x, params))
    assert out_f32.shape == (N, PLANES, H // STRIDE, W // STRIDE), out_f32.shape
    assert jnp.allclose(out_f32, ref, atol=2e-2, rtol=2e-2), \
        float(jnp.max(jnp.abs(out_f32 - ref)))

    # bf16 MXU path (default): bf16 matmul inputs / stored pre-BN activations,
    # f32 accumulation and BN statistics — looser tolerance for bf16 rounding.
    fwd_bf16 = jax.jit(functools.partial(
        basic_block_forward, stride=STRIDE, planes=PLANES, relu_output=True,
        compute_dtype=jnp.bfloat16))
    out_bf16 = jax.block_until_ready(fwd_bf16(x, params))
    assert out_bf16.shape == (N, PLANES, H // STRIDE, W // STRIDE), out_bf16.shape
    assert jnp.allclose(out_bf16, ref, atol=1e-1, rtol=1e-1), \
        float(jnp.max(jnp.abs(out_bf16 - ref)))

    print("KERNEL_OK")
</pallas_src>

<mosaic_0001>
module attributes {stable_mosaic.version = 11 : i64} {
  func.func @kernel(%arg0: i32, %arg1: memref<1x9x9x4xf32, #tpu.memory_space<vmem>>, %arg2: memref<1x9x9x4xf32, #tpu.memory_space<vmem>>, %arg3: memref<1x9x9x4xf32, #tpu.memory_space<vmem>>, %arg4: memref<1x9x9x4xf32, #tpu.memory_space<vmem>>, %arg5: memref<9x4x128xf32, #tpu.memory_space<vmem>>, %arg6: memref<64x128xf32, #tpu.memory_space<vmem>>, %arg7: memref<1x2x128xf32, #tpu.memory_space<vmem>>, %arg8: memref<64x128xf32, #tpu.memory_space<vmem>>) attributes {dimension_semantics = [#tpu.dimension_semantics<parallel>], iteration_bounds = array<i64: 2>, scalar_prefetch = 0 : i64, scratch_operands = 1 : i64, tpu.core_type = #tpu.core_type<tc>, window_params = [{transform_indices = @transform_0, window_bounds = array<i64: 1, 9, 9, 4>}, {transform_indices = @transform_1, window_bounds = array<i64: 1, 9, 9, 4>}, {transform_indices = @transform_2, window_bounds = array<i64: 1, 9, 9, 4>}, {transform_indices = @transform_3, window_bounds = array<i64: 1, 9, 9, 4>}, {pipeline_mode = #tpu.pipeline_mode<synchronous>, transform_indices = @transform_4, window_bounds = array<i64: 9, 4, 128>}, {transform_indices = @transform_5, window_bounds = array<i64: 64, 128>}, {transform_indices = @transform_6, window_bounds = array<i64: 1, 2, 128>}]} {
    %c0 = arith.constant 0 : index
    %c0_0 = arith.constant 0 : index
    %c0_1 = arith.constant 0 : index
    %c0_2 = arith.constant 0 : index
    %0 = vector.load %arg1[%c0, %c0_0, %c0_1, %c0_2] : memref<1x9x9x4xf32, #tpu.memory_space<vmem>>, vector<1x8x8x4xf32>
    %1 = vector.shape_cast %0 : vector<1x8x8x4xf32> to vector<64x4xf32>
    %c0_3 = arith.constant 0 : index
    %c0_4 = arith.constant 0 : index
    %c0_5 = arith.constant 0 : index
    %2 = vector.load %arg5[%c0_3, %c0_4, %c0_5] : memref<9x4x128xf32, #tpu.memory_space<vmem>>, vector<1x4x128xf32>
    %3 = vector.shape_cast %2 : vector<1x4x128xf32> to vector<4x128xf32>
    %cst = arith.constant dense<0.000000e+00> : vector<64x128xf32>
    %4 = tpu.matmul %1, %3, %cst {dimension_numbers = #tpu.dot_dimension_numbers<[1], [0], [0], [1], [0, 0, 1, 1], [], []>} : vector<64x4xf32>, vector<4x128xf32>, vector<64x128xf32> -> vector<64x128xf32>
    %c0_6 = arith.constant 0 : index
    %c0_7 = arith.constant 0 : index
    %5 = vector.load %arg8[%c0_6, %c0_7] : memref<64x128xf32, #tpu.memory_space<vmem>>, vector<64x128xf32>
    tpu.vector_store %arg8[%c0_6, %c0_7], %4 {strides = array<i32>} : memref<64x128xf32, #tpu.memory_space<vmem>>, vector<64x128xf32>,
    %c0_8 = arith.constant 0 : index
    %c0_9 = arith.constant 0 : index
    %c0_10 = arith.constant 0 : index
    %c0_11 = arith.constant 0 : index
    %6 = vector.load %arg2[%c0_8, %c0_9, %c0_10, %c0_11] : memref<1x9x9x4xf32, #tpu.memory_space<vmem>>, vector<1x8x8x4xf32>
    %7 = vector.shape_cast %6 : vector<1x8x8x4xf32> to vector<64x4xf32>
    %c1 = arith.constant 1 : index
    %c0_12 = arith.constant 0 : index
    %c0_13 = arith.constant 0 : index
    %8 = vector.load %arg5[%c1, %c0_12, %c0_13] : memref<9x4x128xf32, #tpu.memory_space<vmem>>, vector<1x4x128xf32>
    %9 = vector.shape_cast %8 : vector<1x4x128xf32> to vector<4x128xf32>
    %cst_14 = arith.constant dense<0.000000e+00> : vector<64x128xf32>
    %10 = tpu.matmul %7, %9, %cst_14 {dimension_numbers = #tpu.dot_dimension_numbers<[1], [0], [0], [1], [0, 0, 1, 1], [], []>} : vector<64x4xf32>, vector<4x128xf32>, vector<64x128xf32> -> vector<64x128xf32>
    %c0_15 = arith.constant 0 : index
    %c0_16 = arith.constant 0 : index
    %11 = vector.load %arg8[%c0_15, %c0_16] : memref<64x128xf32, #tpu.memory_space<vmem>>, vector<64x128xf32>
    %12 = arith.addf %11, %10 : vector<64x128xf32>
    %c0_17 = arith.constant 0 : index
    %c0_18 = arith.constant 0 : index
    %13 = vector.load %arg8[%c0_17, %c0_18] : memref<64x128xf32, #tpu.memory_space<vmem>>, vector<64x128xf32>
    tpu.vector_store %arg8[%c0_17, %c0_18], %12 {strides = array<i32>} : memref<64x128xf32, #tpu.memory_space<vmem>>, vector<64x128xf32>,
    %c0_19 = arith.constant 0 : index
    %c0_20 = arith.constant 0 : index
    %c1_21 = arith.constant 1 : index
    %c0_22 = arith.constant 0 : index
    %14 = vector.load %arg1[%c0_19, %c0_20, %c1_21, %c0_22] : memref<1x9x9x4xf32, #tpu.memory_space<vmem>>, vector<1x8x8x4xf32>
    %15 = vector.shape_cast %14 : vector<1x8x8x4xf32> to vector<64x4xf32>
    %c2 = arith.constant 2 : index
    %c0_23 = arith.constant 0 : index
    %c0_24 = arith.constant 0 : index
    %16 = vector.load %arg5[%c2, %c0_23, %c0_24] : memref<9x4x128xf32, #tpu.memory_space<vmem>>, vector<1x4x128xf32>
    %17 = vector.shape_cast %16 : vector<1x4x128xf32> to vector<4x128xf32>
    %cst_25 = arith.constant dense<0.000000e+00> : vector<64x128xf32>
    %18 = tpu.matmul %15, %17, %cst_25 {dimension_numbers = #tpu.dot_dimension_numbers<[1], [0], [0], [1], [0, 0, 1, 1], [], []>} : vector<64x4xf32>, vector<4x128xf32>, vector<64x128xf32> -> vector<64x128xf32>
    %c0_26 = arith.constant 0 : index
    %c0_27 = arith.constant 0 : index
    %19 = vector.load %arg8[%c0_26, %c0_27] : memref<64x128xf32, #tpu.memory_space<vmem>>, vector<64x128xf32>
    %20 = arith.addf %19, %18 : vector<64x128xf32>
    %c0_28 = arith.constant 0 : index
    %c0_29 = arith.constant 0 : index
    %21 = vector.load %arg8[%c0_28, %c0_29] : memref<64x128xf32, #tpu.memory_space<vmem>>, vector<64x128xf32>
    tpu.vector_store %arg8[%c0_28, %c0_29], %20 {strides = array<i32>} : memref<64x128xf32, #tpu.memory_space<vmem>>, vector<64x128xf32>,
    %c0_30 = arith.constant 0 : index
    %c0_31 = arith.constant 0 : index
    %c0_32 = arith.constant 0 : index
    %c0_33 = arith.constant 0 : index
    %22 = vector.load %arg3[%c0_30, %c0_31, %c0_32, %c0_33] : memref<1x9x9x4xf32, #tpu.memory_space<vmem>>, vector<1x8x8x4xf32>
    %23 = vector.shape_cast %22 : vector<1x8x8x4xf32> to vector<64x4xf32>
    %c3 = arith.constant 3 : index
    %c0_34 = arith.constant 0 : index
    %c0_35 = arith.constant 0 : index
    %24 = vector.load %arg5[%c3, %c0_34, %c0_35] : memref<9x4x128xf32, #tpu.memory_space<vmem>>, vector<1x4x128xf32>
    %25 = vector.shape_cast %24 : vector<1x4x128xf32> to vector<4x128xf32>
    %cst_36 = arith.constant dense<0.000000e+00> : vector<64x128xf32>
    %26 = tpu.matmul %23, %25, %cst_36 {dimension_numbers = #tpu.dot_dimension_numbers<[1], [0], [0], [1], [0, 0, 1, 1], [], []>} : vector<64x4xf32>, vector<4x128xf32>, vector<64x128xf32> -> vector<64x128xf32>
    %c0_37 = arith.constant 0 : index
    %c0_38 = arith.constant 0 : index
    %27 = vector.load %arg8[%c0_37, %c0_38] : memref<64x128xf32, #tpu.memory_space<vmem>>, vector<64x128xf32>
    %28 = arith.addf %27, %26 : vector<64x128xf32>
    %c0_39 = arith.constant 0 : index
    %c0_40 = arith.constant 0 : index
    %29 = vector.load %arg8[%c0_39, %c0_40] : memref<64x128xf32, #tpu.memory_space<vmem>>, vector<64x128xf32>
    tpu.vector_store %arg8[%c0_39, %c0_40], %28 {strides = array<i32>} : memref<64x128xf32, #tpu.memory_space<vmem>>, vector<64x128xf32>,
    %c0_41 = arith.constant 0 : index
    %c0_42 = arith.constant 0 : index
    %c0_43 = arith.constant 0 : index
    %c0_44 = arith.constant 0 : index
    %30 = vector.load %arg4[%c0_41, %c0_42, %c0_43, %c0_44] : memref<1x9x9x4xf32, #tpu.memory_space<vmem>>, vector<1x8x8x4xf32>
    %31 = vector.shape_cast %30 : vector<1x8x8x4xf32> to vector<64x4xf32>
    %c4 = arith.constant 4 : index
    %c0_45 = arith.constant 0 : index
    %c0_46 = arith.constant 0 : index
    %32 = vector.load %arg5[%c4, %c0_45, %c0_46] : memref<9x4x128xf32, #tpu.memory_space<vmem>>, vector<1x4x128xf32>
    %33 = vector.shape_cast %32 : vector<1x4x128xf32> to vector<4x128xf32>
    %cst_47 = arith.constant dense<0.000000e+00> : vector<64x128xf32>
    %34 = tpu.matmul %31, %33, %cst_47 {dimension_numbers = #tpu.dot_dimension_numbers<[1], [0], [0], [1], [0, 0, 1, 1], [], []>} : vector<64x4xf32>, vector<4x128xf32>, vector<64x128xf32> -> vector<64x128xf32>
    %c0_48 = arith.constant 0 : index
    %c0_49 = arith.constant 0 : index
    %35 = vector.load %arg8[%c0_48, %c0_49] : memref<64x128xf32, #tpu.memory_space<vmem>>, vector<64x128xf32>
    %36 = arith.addf %35, %34 : vector<64x128xf32>
    %c0_50 = arith.constant 0 : index
    %c0_51 = arith.constant 0 : index
    %37 = vector.load %arg8[%c0_50, %c0_51] : memref<64x128xf32, #tpu.memory_space<vmem>>, vector<64x128xf32>
    tpu.vector_store %arg8[%c0_50, %c0_51], %36 {strides = array<i32>} : memref<64x128xf32, #tpu.memory_space<vmem>>, vector<64x128xf32>,
    %c0_52 = arith.constant 0 : index
    %c0_53 = arith.constant 0 : index
    %c1_54 = arith.constant 1 : index
    %c0_55 = arith.constant 0 : index
    %38 = vector.load %arg3[%c0_52, %c0_53, %c1_54, %c0_55] : memref<1x9x9x4xf32, #tpu.memory_space<vmem>>, vector<1x8x8x4xf32>
    %39 = vector.shape_cast %38 : vector<1x8x8x4xf32> to vector<64x4xf32>
    %c5 = arith.constant 5 : index
    %c0_56 = arith.constant 0 : index
    %c0_57 = arith.constant 0 : index
    %40 = vector.load %arg5[%c5, %c0_56, %c0_57] : memref<9x4x128xf32, #tpu.memory_space<vmem>>, vector<1x4x128xf32>
    %41 = vector.shape_cast %40 : vector<1x4x128xf32> to vector<4x128xf32>
    %cst_58 = arith.constant dense<0.000000e+00> : vector<64x128xf32>
    %42 = tpu.matmul %39, %41, %cst_58 {dimension_numbers = #tpu.dot_dimension_numbers<[1], [0], [0], [1], [0, 0, 1, 1], [], []>} : vector<64x4xf32>, vector<4x128xf32>, vector<64x128xf32> -> vector<64x128xf32>
    %c0_59 = arith.constant 0 : index
    %c0_60 = arith.constant 0 : index
    %43 = vector.load %arg8[%c0_59, %c0_60] : memref<64x128xf32, #tpu.memory_space<vmem>>, vector<64x128xf32>
    %44 = arith.addf %43, %42 : vector<64x128xf32>
    %c0_61 = arith.constant 0 : index
    %c0_62 = arith.constant 0 : index
    %45 = vector.load %arg8[%c0_61, %c0_62] : memref<64x128xf32, #tpu.memory_space<vmem>>, vector<64x128xf32>
    tpu.vector_store %arg8[%c0_61, %c0_62], %44 {strides = array<i32>} : memref<64x128xf32, #tpu.memory_space<vmem>>, vector<64x128xf32>,
    %c0_63 = arith.constant 0 : index
    %c1_64 = arith.constant 1 : index
    %c0_65 = arith.constant 0 : index
    %c0_66 = arith.constant 0 : index
    %46 = vector.load %arg1[%c0_63, %c1_64, %c0_65, %c0_66] : memref<1x9x9x4xf32, #tpu.memory_space<vmem>>, vector<1x8x8x4xf32>
    %47 = vector.shape_cast %46 : vector<1x8x8x4xf32> to vector<64x4xf32>
    %c6 = arith.constant 6 : index
    %c0_67 = arith.constant 0 : index
    %c0_68 = arith.constant 0 : index
    %48 = vector.load %arg5[%c6, %c0_67, %c0_68] : memref<9x4x128xf32, #tpu.memory_space<vmem>>, vector<1x4x128xf32>
    %49 = vector.shape_cast %48 : vector<1x4x128xf32> to vector<4x128xf32>
    %cst_69 = arith.constant dense<0.000000e+00> : vector<64x128xf32>
    %50 = tpu.matmul %47, %49, %cst_69 {dimension_numbers = #tpu.dot_dimension_numbers<[1], [0], [0], [1], [0, 0, 1, 1], [], []>} : vector<64x4xf32>, vector<4x128xf32>, vector<64x128xf32> -> vector<64x128xf32>
    %c0_70 = arith.constant 0 : index
    %c0_71 = arith.constant 0 : index
    %51 = vector.load %arg8[%c0_70, %c0_71] : memref<64x128xf32, #tpu.memory_space<vmem>>, vector<64x128xf32>
    %52 = arith.addf %51, %50 : vector<64x128xf32>
    %c0_72 = arith.constant 0 : index
    %c0_73 = arith.constant 0 : index
    %53 = vector.load %arg8[%c0_72, %c0_73] : memref<64x128xf32, #tpu.memory_space<vmem>>, vector<64x128xf32>
    tpu.vector_store %arg8[%c0_72, %c0_73], %52 {strides = array<i32>} : memref<64x128xf32, #tpu.memory_space<vmem>>, vector<64x128xf32>,
    %c0_74 = arith.constant 0 : index
    %c1_75 = arith.constant 1 : index
    %c0_76 = arith.constant 0 : index
    %c0_77 = arith.constant 0 : index
    %54 = vector.load %arg2[%c0_74, %c1_75, %c0_76, %c0_77] : memref<1x9x9x4xf32, #tpu.memory_space<vmem>>, vector<1x8x8x4xf32>
    %55 = vector.shape_cast %54 : vector<1x8x8x4xf32> to vector<64x4xf32>
    %c7 = arith.constant 7 : index
    %c0_78 = arith.constant 0 : index
    %c0_79 = arith.constant 0 : index
    %56 = vector.load %arg5[%c7, %c0_78, %c0_79] : memref<9x4x128xf32, #tpu.memory_space<vmem>>, vector<1x4x128xf32>
    %57 = vector.shape_cast %56 : vector<1x4x128xf32> to vector<4x128xf32>
    %cst_80 = arith.constant dense<0.000000e+00> : vector<64x128xf32>
    %58 = tpu.matmul %55, %57, %cst_80 {dimension_numbers = #tpu.dot_dimension_numbers<[1], [0], [0], [1], [0, 0, 1, 1], [], []>} : vector<64x4xf32>, vector<4x128xf32>, vector<64x128xf32> -> vector<64x128xf32>
    %c0_81 = arith.constant 0 : index
    %c0_82 = arith.constant 0 : index
    %59 = vector.load %arg8[%c0_81, %c0_82] : memref<64x128xf32, #tpu.memory_space<vmem>>, vector<64x128xf32>
    %60 = arith.addf %59, %58 : vector<64x128xf32>
    %c0_83 = arith.constant 0 : index
    %c0_84 = arith.constant 0 : index
    %61 = vector.load %arg8[%c0_83, %c0_84] : memref<64x128xf32, #tpu.memory_space<vmem>>, vector<64x128xf32>
    tpu.vector_store %arg8[%c0_83, %c0_84], %60 {strides = array<i32>} : memref<64x128xf32, #tpu.memory_space<vmem>>, vector<64x128xf32>,
    %c0_85 = arith.constant 0 : index
    %c1_86 = arith.constant 1 : index
    %c1_87 = arith.constant 1 : index
    %c0_88 = arith.constant 0 : index
    %62 = vector.load %arg1[%c0_85, %c1_86, %c1_87, %c0_88] : memref<1x9x9x4xf32, #tpu.memory_space<vmem>>, vector<1x8x8x4xf32>
    %63 = vector.shape_cast %62 : vector<1x8x8x4xf32> to vector<64x4xf32>
    %c8 = arith.constant 8 : index
    %c0_89 = arith.constant 0 : index
    %c0_90 = arith.constant 0 : index
    %64 = vector.load %arg5[%c8, %c0_89, %c0_90] : memref<9x4x128xf32, #tpu.memory_space<vmem>>, vector<1x4x128xf32>
    %65 = vector.shape_cast %64 : vector<1x4x128xf32> to vector<4x128xf32>
    %cst_91 = arith.constant dense<0.000000e+00> : vector<64x128xf32>
    %66 = tpu.matmul %63, %65, %cst_91 {dimension_numbers = #tpu.dot_dimension_numbers<[1], [0], [0], [1], [0, 0, 1, 1], [], []>} : vector<64x4xf32>, vector<4x128xf32>, vector<64x128xf32> -> vector<64x128xf32>
    %c0_92 = arith.constant 0 : index
    %c0_93 = arith.constant 0 : index
    %67 = vector.load %arg8[%c0_92, %c0_93] : memref<64x128xf32, #tpu.memory_space<vmem>>, vector<64x128xf32>
    %68 = arith.addf %67, %66 : vector<64x128xf32>
    %c0_94 = arith.constant 0 : index
    %c0_95 = arith.constant 0 : index
    %69 = vector.load %arg8[%c0_94, %c0_95] : memref<64x128xf32, #tpu.memory_space<vmem>>, vector<64x128xf32>
    tpu.vector_store %arg8[%c0_94, %c0_95], %68 {strides = array<i32>} : memref<64x128xf32, #tpu.memory_space<vmem>>, vector<64x128xf32>,
    %c0_96 = arith.constant 0 : index
    %c0_97 = arith.constant 0 : index
    %70 = vector.load %arg8[%c0_96, %c0_97] : memref<64x128xf32, #tpu.memory_space<vmem>>, vector<64x128xf32>
    %c0_98 = arith.constant 0 : index
    %c0_99 = arith.constant 0 : index
    %71 = vector.load %arg6[%c0_98, %c0_99] : memref<64x128xf32, #tpu.memory_space<vmem>>, vector<64x128xf32>
    tpu.vector_store %arg6[%c0_98, %c0_99], %70 {strides = array<i32>} : memref<64x128xf32, #tpu.memory_space<vmem>>, vector<64x128xf32>,
    %cst_100 = arith.constant 0.000000e+00 : f32
    %72 = vector.broadcast %cst_100 : f32 to vector<1x128xf32>
    %cst_101 = arith.constant 0.000000e+00 : f32
    %73 = vector.broadcast %cst_101 : f32 to vector<1x128xf32>
    %c0_102 = arith.constant 0 : index
    %c0_103 = arith.constant 0 : index
    %74 = vector.load %arg8[%c0_102, %c0_103] : memref<64x128xf32, #tpu.memory_space<vmem>>, vector<64x128xf32>
    %cst_104 = arith.constant dense<0.000000e+00> : vector<128xf32>
    %75 = vector.multi_reduction <add>, %74, %cst_104 [0] : vector<64x128xf32> to vector<128xf32>
    %76 = vector.shape_cast %75 : vector<128xf32> to vector<1x128xf32>
    %77 = arith.addf %72, %76 : vector<1x128xf32>
    %78 = arith.mulf %74, %74 : vector<64x128xf32>
    %cst_105 = arith.constant dense<0.000000e+00> : vector<128xf32>
    %79 = vector.multi_reduction <add>, %78, %cst_105 [0] : vector<64x128xf32> to vector<128xf32>
    %80 = vector.shape_cast %79 : vector<128xf32> to vector<1x128xf32>
    %81 = arith.addf %73, %80 : vector<1x128xf32>
    %82 = tpu.concatenate %77, %81 in 0 : vector<1x128xf32>, vector<1x128xf32> -> vector<2x128xf32>
    %c0_106 = arith.constant 0 : index
    %c0_107 = arith.constant 0 : index
    %c0_108 = arith.constant 0 : index
    %83 = vector.load %arg7[%c0_106, %c0_107, %c0_108] : memref<1x2x128xf32, #tpu.memory_space<vmem>>, vector<1x2x128xf32>
    %84 = vector.shape_cast %83 : vector<1x2x128xf32> to vector<2x128xf32>
    %85 = vector.shape_cast %82 : vector<2x128xf32> to vector<1x2x128xf32>
    tpu.vector_store %arg7[%c0_106, %c0_107, %c0_108], %85 {strides = array<i32>} : memref<1x2x128xf32, #tpu.memory_space<vmem>>, vector<1x2x128xf32>,
    return
  }
  func.func @transform_0(%arg0: i32) -> (i32, i32, i32, i32) {
    %c0_i32 = arith.constant 0 : i32
    %c0_i32_0 = arith.constant 0 : i32
    %c0_i32_1 = arith.constant 0 : i32
    %c0_i32_2 = arith.constant 0 : i32
    return %arg0, %c0_i32, %c0_i32_0, %c0_i32_1 : i32, i32, i32, i32
  }
  func.func @transform_1(%arg0: i32) -> (i32, i32, i32, i32) {
    %c0_i32 = arith.constant 0 : i32
    %c0_i32_0 = arith.constant 0 : i32
    %c0_i32_1 = arith.constant 0 : i32
    %c0_i32_2 = arith.constant 0 : i32
    return %arg0, %c0_i32, %c0_i32_0, %c0_i32_1 : i32, i32, i32, i32
  }
  func.func @transform_2(%arg0: i32) -> (i32, i32, i32, i32) {
    %c0_i32 = arith.constant 0 : i32
    %c0_i32_0 = arith.constant 0 : i32
    %c0_i32_1 = arith.constant 0 : i32
    %c0_i32_2 = arith.constant 0 : i32
    return %arg0, %c0_i32, %c0_i32_0, %c0_i32_1 : i32, i32, i32, i32
  }
  func.func @transform_3(%arg0: i32) -> (i32, i32, i32, i32) {
    %c0_i32 = arith.constant 0 : i32
    %c0_i32_0 = arith.constant 0 : i32
    %c0_i32_1 = arith.constant 0 : i32
    %c0_i32_2 = arith.constant 0 : i32
    return %arg0, %c0_i32, %c0_i32_0, %c0_i32_1 : i32, i32, i32, i32
  }
  func.func @transform_4(%arg0: i32) -> (i32, i32, i32) {
    %c0_i32 = arith.constant 0 : i32
    %c0_i32_0 = arith.constant 0 : i32
    %c0_i32_1 = arith.constant 0 : i32
    %c0_i32_2 = arith.constant 0 : i32
    return %c0_i32, %c0_i32_0, %c0_i32_1 : i32, i32, i32
  }
  func.func @transform_5(%arg0: i32) -> (i32, i32) {
    %c0_i32 = arith.constant 0 : i32
    %c0_i32_0 = arith.constant 0 : i32
    return %arg0, %c0_i32 : i32, i32
  }
  func.func @transform_6(%arg0: i32) -> (i32, i32, i32) {
    %c0_i32 = arith.constant 0 : i32
    %c0_i32_0 = arith.constant 0 : i32
    %c0_i32_1 = arith.constant 0 : i32
    return %arg0, %c0_i32, %c0_i32_0 : i32, i32, i32
  }
}

module attributes {stable_mosaic.version = 11 : i64} {
  func.func @kernel(%arg0: i32, %arg1: memref<64x128xf32, #tpu.memory_space<vmem>>, %arg2: memref<2x128xf32, #tpu.memory_space<vmem>>, %arg3: memref<9x128x128xf32, #tpu.memory_space<vmem>>, %arg4: memref<64x4xf32, #tpu.memory_space<vmem>>, %arg5: memref<4x128xf32, #tpu.memory_space<vmem>>, %arg6: memref<64x128xf32, #tpu.memory_space<vmem>>, %arg7: memref<64x128xf32, #tpu.memory_space<vmem>>, %arg8: memref<1x4x128xf32, #tpu.memory_space<vmem>>, %arg9: memref<64x128xf32, #tpu.memory_space<vmem>>, %arg10: memref<1x10x10x128xf32, #tpu.memory_space<vmem>>) attributes {dimension_semantics = [#tpu.dimension_semantics<parallel>], iteration_bounds = array<i64: 2>, scalar_prefetch = 0 : i64, scratch_operands = 2 : i64, tpu.core_type = #tpu.core_type<tc>, window_params = [{transform_indices = @transform_0, window_bounds = array<i64: 64, 128>}, {pipeline_mode = #tpu.pipeline_mode<synchronous>, transform_indices = @transform_1, window_bounds = array<i64: 2, 128>}, {pipeline_mode = #tpu.pipeline_mode<synchronous>, transform_indices = @transform_2, window_bounds = array<i64: 9, 128, 128>}, {transform_indices = @transform_3, window_bounds = array<i64: 64, 4>}, {pipeline_mode = #tpu.pipeline_mode<synchronous>, transform_indices = @transform_4, window_bounds = array<i64: 4, 128>}, {transform_indices = @transform_5, window_bounds = array<i64: 64, 128>}, {transform_indices = @transform_6, window_bounds = array<i64: 64, 128>}, {transform_indices = @transform_7, window_bounds = array<i64: 1, 4, 128>}]} {
    %cst = arith.constant 0.000000e+00 : f32
    %0 = vector.broadcast %cst : f32 to vector<1x10x10x128xf32>
    %c0 = arith.constant 0 : index
    %c0_0 = arith.constant 0 : index
    %c0_1 = arith.constant 0 : index
    %c0_2 = arith.constant 0 : index
    %1 = vector.load %arg10[%c0, %c0_0, %c0_1, %c0_2] : memref<1x10x10x128xf32, #tpu.memory_space<vmem>>, vector<1x10x10x128xf32>
    tpu.vector_store %arg10[%c0, %c0_0, %c0_1, %c0_2], %0 {strides = array<i32>} : memref<1x10x10x128xf32, #tpu.memory_space<vmem>>, vector<1x10x10x128xf32>,
    %c0_3 = arith.constant 0 : index
    %c0_4 = arith.constant 0 : index
    %2 = vector.load %arg2[%c0_3, %c0_4] : memref<2x128xf32, #tpu.memory_space<vmem>>, vector<1x128xf32>
    %c1 = arith.constant 1 : index
    %c0_5 = arith.constant 0 : index
    %3 = vector.load %arg2[%c1, %c0_5] : memref<2x128xf32, #tpu.memory_space<vmem>>, vector<1x128xf32>
    %c0_6 = arith.constant 0 : index
    %c0_7 = arith.constant 0 : index
    %4 = vector.load %arg1[%c0_6, %c0_7] : memref<64x128xf32, #tpu.memory_space<vmem>>, vector<64x128xf32>
    %5 = vector.broadcast %2 : vector<1x128xf32> to vector<64x128xf32>
    %6 = arith.mulf %4, %5 : vector<64x128xf32>
    %7 = vector.broadcast %3 : vector<1x128xf32> to vector<64x128xf32>
    %8 = arith.addf %6, %7 : vector<64x128xf32>
    %cst_8 = arith.constant 0.000000e+00 : f32
    %9 = vector.broadcast %cst_8 : f32 to vector<64x128xf32>
    %10 = arith.maximumf %8, %9 : vector<64x128xf32>
    %11 = vector.shape_cast %10 : vector<64x128xf32> to vector<8x8x128xf32>
    %c0_9 = arith.constant 0 : index
    %c1_10 = arith.constant 1 : index
    %c1_11 = arith.constant 1 : index
    %c0_12 = arith.constant 0 : index
    %12 = vector.load %arg10[%c0_9, %c1_10, %c1_11, %c0_12] : memref<1x10x10x128xf32, #tpu.memory_space<vmem>>, vector<1x8x8x128xf32>
    %13 = vector.shape_cast %12 : vector<1x8x8x128xf32> to vector<8x8x128xf32>
    %14 = vector.shape_cast %11 : vector<8x8x128xf32> to vector<1x8x8x128xf32>
    tpu.vector_store %arg10[%c0_9, %c1_10, %c1_11, %c0_12], %14 {strides = array<i32>} : memref<1x10x10x128xf32, #tpu.memory_space<vmem>>, vector<1x8x8x128xf32>,
    %c0_13 = arith.constant 0 : index
    %c0_14 = arith.constant 0 : index
    %c0_15 = arith.constant 0 : index
    %c0_16 = arith.constant 0 : index
    %15 = vector.load %arg10[%c0_13, %c0_14, %c0_15, %c0_16] : memref<1x10x10x128xf32, #tpu.memory_space<vmem>>, vector<1x8x8x128xf32>
    %16 = vector.shape_cast %15 : vector<1x8x8x128xf32> to vector<64x128xf32>
    %c0_17 = arith.constant 0 : index
    %c0_18 = arith.constant 0 : index
    %c0_19 = arith.constant 0 : index
    %17 = vector.load %arg3[%c0_17, %c0_18, %c0_19] : memref<9x128x128xf32, #tpu.memory_space<vmem>>, vector<1x128x128xf32>
    %18 = vector.shape_cast %17 : vector<1x128x128xf32> to vector<128x128xf32>
    %cst_20 = arith.constant dense<0.000000e+00> : vector<64x128xf32>
    %19 = tpu.matmul %16, %18, %cst_20 {dimension_numbers = #tpu.dot_dimension_numbers<[1], [0], [0], [1], [0, 0, 1, 1], [], []>} : vector<64x128xf32>, vector<128x128xf32>, vector<64x128xf32> -> vector<64x128xf32>
    %c0_21 = arith.constant 0 : index
    %c0_22 = arith.constant 0 : index
    %20 = vector.load %arg9[%c0_21, %c0_22] : memref<64x128xf32, #tpu.memory_space<vmem>>, vector<64x128xf32>
    tpu.vector_store %arg9[%c0_21, %c0_22], %19 {strides = array<i32>} : memref<64x128xf32, #tpu.memory_space<vmem>>, vector<64x128xf32>,
    %c0_23 = arith.constant 0 : index
    %c0_24 = arith.constant 0 : index
    %c1_25 = arith.constant 1 : index
    %c0_26 = arith.constant 0 : index
    %21 = vector.load %arg10[%c0_23, %c0_24, %c1_25, %c0_26] : memref<1x10x10x128xf32, #tpu.memory_space<vmem>>, vector<1x8x8x128xf32>
    %22 = vector.shape_cast %21 : vector<1x8x8x128xf32> to vector<64x128xf32>
    %c1_27 = arith.constant 1 : index
    %c0_28 = arith.constant 0 : index
    %c0_29 = arith.constant 0 : index
    %23 = vector.load %arg3[%c1_27, %c0_28, %c0_29] : memref<9x128x128xf32, #tpu.memory_space<vmem>>, vector<1x128x128xf32>
    %24 = vector.shape_cast %23 : vector<1x128x128xf32> to vector<128x128xf32>
    %cst_30 = arith.constant dense<0.000000e+00> : vector<64x128xf32>
    %25 = tpu.matmul %22, %24, %cst_30 {dimension_numbers = #tpu.dot_dimension_numbers<[1], [0], [0], [1], [0, 0, 1, 1], [], []>} : vector<64x128xf32>, vector<128x128xf32>, vector<64x128xf32> -> vector<64x128xf32>
    %c0_31 = arith.constant 0 : index
    %c0_32 = arith.constant 0 : index
    %26 = vector.load %arg9[%c0_31, %c0_32] : memref<64x128xf32, #tpu.memory_space<vmem>>, vector<64x128xf32>
    %27 = arith.addf %26, %25 : vector<64x128xf32>
    %c0_33 = arith.constant 0 : index
    %c0_34 = arith.constant 0 : index
    %28 = vector.load %arg9[%c0_33, %c0_34] : memref<64x128xf32, #tpu.memory_space<vmem>>, vector<64x128xf32>
    tpu.vector_store %arg9[%c0_33, %c0_34], %27 {strides = array<i32>} : memref<64x128xf32, #tpu.memory_space<vmem>>, vector<64x128xf32>,
    %c0_35 = arith.constant 0 : index
    %c0_36 = arith.constant 0 : index
    %c2 = arith.constant 2 : index
    %c0_37 = arith.constant 0 : index
    %29 = vector.load %arg10[%c0_35, %c0_36, %c2, %c0_37] : memref<1x10x10x128xf32, #tpu.memory_space<vmem>>, vector<1x8x8x128xf32>
    %30 = vector.shape_cast %29 : vector<1x8x8x128xf32> to vector<64x128xf32>
    %c2_38 = arith.constant 2 : index
    %c0_39 = arith.constant 0 : index
    %c0_40 = arith.constant 0 : index
    %31 = vector.load %arg3[%c2_38, %c0_39, %c0_40] : memref<9x128x128xf32, #tpu.memory_space<vmem>>, vector<1x128x128xf32>
    %32 = vector.shape_cast %31 : vector<1x128x128xf32> to vector<128x128xf32>
    %cst_41 = arith.constant dense<0.000000e+00> : vector<64x128xf32>
    %33 = tpu.matmul %30, %32, %cst_41 {dimension_numbers = #tpu.dot_dimension_numbers<[1], [0], [0], [1], [0, 0, 1, 1], [], []>} : vector<64x128xf32>, vector<128x128xf32>, vector<64x128xf32> -> vector<64x128xf32>
    %c0_42 = arith.constant 0 : index
    %c0_43 = arith.constant 0 : index
    %34 = vector.load %arg9[%c0_42, %c0_43] : memref<64x128xf32, #tpu.memory_space<vmem>>, vector<64x128xf32>
    %35 = arith.addf %34, %33 : vector<64x128xf32>
    %c0_44 = arith.constant 0 : index
    %c0_45 = arith.constant 0 : index
    %36 = vector.load %arg9[%c0_44, %c0_45] : memref<64x128xf32, #tpu.memory_space<vmem>>, vector<64x128xf32>
    tpu.vector_store %arg9[%c0_44, %c0_45], %35 {strides = array<i32>} : memref<64x128xf32, #tpu.memory_space<vmem>>, vector<64x128xf32>,
    %c0_46 = arith.constant 0 : index
    %c1_47 = arith.constant 1 : index
    %c0_48 = arith.constant 0 : index
    %c0_49 = arith.constant 0 : index
    %37 = vector.load %arg10[%c0_46, %c1_47, %c0_48, %c0_49] : memref<1x10x10x128xf32, #tpu.memory_space<vmem>>, vector<1x8x8x128xf32>
    %38 = vector.shape_cast %37 : vector<1x8x8x128xf32> to vector<64x128xf32>
    %c3 = arith.constant 3 : index
    %c0_50 = arith.constant 0 : index
    %c0_51 = arith.constant 0 : index
    %39 = vector.load %arg3[%c3, %c0_50, %c0_51] : memref<9x128x128xf32, #tpu.memory_space<vmem>>, vector<1x128x128xf32>
    %40 = vector.shape_cast %39 : vector<1x128x128xf32> to vector<128x128xf32>
    %cst_52 = arith.constant dense<0.000000e+00> : vector<64x128xf32>
    %41 = tpu.matmul %38, %40, %cst_52 {dimension_numbers = #tpu.dot_dimension_numbers<[1], [0], [0], [1], [0, 0, 1, 1], [], []>} : vector<64x128xf32>, vector<128x128xf32>, vector<64x128xf32> -> vector<64x128xf32>
    %c0_53 = arith.constant 0 : index
    %c0_54 = arith.constant 0 : index
    %42 = vector.load %arg9[%c0_53, %c0_54] : memref<64x128xf32, #tpu.memory_space<vmem>>, vector<64x128xf32>
    %43 = arith.addf %42, %41 : vector<64x128xf32>
    %c0_55 = arith.constant 0 : index
    %c0_56 = arith.constant 0 : index
    %44 = vector.load %arg9[%c0_55, %c0_56] : memref<64x128xf32, #tpu.memory_space<vmem>>, vector<64x128xf32>
    tpu.vector_store %arg9[%c0_55, %c0_56], %43 {strides = array<i32>} : memref<64x128xf32, #tpu.memory_space<vmem>>, vector<64x128xf32>,
    %c0_57 = arith.constant 0 : index
    %c1_58 = arith.constant 1 : index
    %c1_59 = arith.constant 1 : index
    %c0_60 = arith.constant 0 : index
    %45 = vector.load %arg10[%c0_57, %c1_58, %c1_59, %c0_60] : memref<1x10x10x128xf32, #tpu.memory_space<vmem>>, vector<1x8x8x128xf32>
    %46 = vector.shape_cast %45 : vector<1x8x8x128xf32> to vector<64x128xf32>
    %c4 = arith.constant 4 : index
    %c0_61 = arith.constant 0 : index
    %c0_62 = arith.constant 0 : index
    %47 = vector.load %arg3[%c4, %c0_61, %c0_62] : memref<9x128x128xf32, #tpu.memory_space<vmem>>, vector<1x128x128xf32>
    %48 = vector.shape_cast %47 : vector<1x128x128xf32> to vector<128x128xf32>
    %cst_63 = arith.constant dense<0.000000e+00> : vector<64x128xf32>
    %49 = tpu.matmul %46, %48, %cst_63 {dimension_numbers = #tpu.dot_dimension_numbers<[1], [0], [0], [1], [0, 0, 1, 1], [], []>} : vector<64x128xf32>, vector<128x128xf32>, vector<64x128xf32> -> vector<64x128xf32>
    %c0_64 = arith.constant 0 : index
    %c0_65 = arith.constant 0 : index
    %50 = vector.load %arg9[%c0_64, %c0_65] : memref<64x128xf32, #tpu.memory_space<vmem>>, vector<64x128xf32>
    %51 = arith.addf %50, %49 : vector<64x128xf32>
    %c0_66 = arith.constant 0 : index
    %c0_67 = arith.constant 0 : index
    %52 = vector.load %arg9[%c0_66, %c0_67] : memref<64x128xf32, #tpu.memory_space<vmem>>, vector<64x128xf32>
    tpu.vector_store %arg9[%c0_66, %c0_67], %51 {strides = array<i32>} : memref<64x128xf32, #tpu.memory_space<vmem>>, vector<64x128xf32>,
    %c0_68 = arith.constant 0 : index
    %c1_69 = arith.constant 1 : index
    %c2_70 = arith.constant 2 : index
    %c0_71 = arith.constant 0 : index
    %53 = vector.load %arg10[%c0_68, %c1_69, %c2_70, %c0_71] : memref<1x10x10x128xf32, #tpu.memory_space<vmem>>, vector<1x8x8x128xf32>
    %54 = vector.shape_cast %53 : vector<1x8x8x128xf32> to vector<64x128xf32>
    %c5 = arith.constant 5 : index
    %c0_72 = arith.constant 0 : index
    %c0_73 = arith.constant 0 : index
    %55 = vector.load %arg3[%c5, %c0_72, %c0_73] : memref<9x128x128xf32, #tpu.memory_space<vmem>>, vector<1x128x128xf32>
    %56 = vector.shape_cast %55 : vector<1x128x128xf32> to vector<128x128xf32>
    %cst_74 = arith.constant dense<0.000000e+00> : vector<64x128xf32>
    %57 = tpu.matmul %54, %56, %cst_74 {dimension_numbers = #tpu.dot_dimension_numbers<[1], [0], [0], [1], [0, 0, 1, 1], [], []>} : vector<64x128xf32>, vector<128x128xf32>, vector<64x128xf32> -> vector<64x128xf32>
    %c0_75 = arith.constant 0 : index
    %c0_76 = arith.constant 0 : index
    %58 = vector.load %arg9[%c0_75, %c0_76] : memref<64x128xf32, #tpu.memory_space<vmem>>, vector<64x128xf32>
    %59 = arith.addf %58, %57 : vector<64x128xf32>
    %c0_77 = arith.constant 0 : index
    %c0_78 = arith.constant 0 : index
    %60 = vector.load %arg9[%c0_77, %c0_78] : memref<64x128xf32, #tpu.memory_space<vmem>>, vector<64x128xf32>
    tpu.vector_store %arg9[%c0_77, %c0_78], %59 {strides = array<i32>} : memref<64x128xf32, #tpu.memory_space<vmem>>, vector<64x128xf32>,
    %c0_79 = arith.constant 0 : index
    %c2_80 = arith.constant 2 : index
    %c0_81 = arith.constant 0 : index
    %c0_82 = arith.constant 0 : index
    %61 = vector.load %arg10[%c0_79, %c2_80, %c0_81, %c0_82] : memref<1x10x10x128xf32, #tpu.memory_space<vmem>>, vector<1x8x8x128xf32>
    %62 = vector.shape_cast %61 : vector<1x8x8x128xf32> to vector<64x128xf32>
    %c6 = arith.constant 6 : index
    %c0_83 = arith.constant 0 : index
    %c0_84 = arith.constant 0 : index
    %63 = vector.load %arg3[%c6, %c0_83, %c0_84] : memref<9x128x128xf32, #tpu.memory_space<vmem>>, vector<1x128x128xf32>
    %64 = vector.shape_cast %63 : vector<1x128x128xf32> to vector<128x128xf32>
    %cst_85 = arith.constant dense<0.000000e+00> : vector<64x128xf32>
    %65 = tpu.matmul %62, %64, %cst_85 {dimension_numbers = #tpu.dot_dimension_numbers<[1], [0], [0], [1], [0, 0, 1, 1], [], []>} : vector<64x128xf32>, vector<128x128xf32>, vector<64x128xf32> -> vector<64x128xf32>
    %c0_86 = arith.constant 0 : index
    %c0_87 = arith.constant 0 : index
    %66 = vector.load %arg9[%c0_86, %c0_87] : memref<64x128xf32, #tpu.memory_space<vmem>>, vector<64x128xf32>
    %67 = arith.addf %66, %65 : vector<64x128xf32>
    %c0_88 = arith.constant 0 : index
    %c0_89 = arith.constant 0 : index
    %68 = vector.load %arg9[%c0_88, %c0_89] : memref<64x128xf32, #tpu.memory_space<vmem>>, vector<64x128xf32>
    tpu.vector_store %arg9[%c0_88, %c0_89], %67 {strides = array<i32>} : memref<64x128xf32, #tpu.memory_space<vmem>>, vector<64x128xf32>,
    %c0_90 = arith.constant 0 : index
    %c2_91 = arith.constant 2 : index
    %c1_92 = arith.constant 1 : index
    %c0_93 = arith.constant 0 : index
    %69 = vector.load %arg10[%c0_90, %c2_91, %c1_92, %c0_93] : memref<1x10x10x128xf32, #tpu.memory_space<vmem>>, vector<1x8x8x128xf32>
    %70 = vector.shape_cast %69 : vector<1x8x8x128xf32> to vector<64x128xf32>
    %c7 = arith.constant 7 : index
    %c0_94 = arith.constant 0 : index
    %c0_95 = arith.constant 0 : index
    %71 = vector.load %arg3[%c7, %c0_94, %c0_95] : memref<9x128x128xf32, #tpu.memory_space<vmem>>, vector<1x128x128xf32>
    %72 = vector.shape_cast %71 : vector<1x128x128xf32> to vector<128x128xf32>
    %cst_96 = arith.constant dense<0.000000e+00> : vector<64x128xf32>
    %73 = tpu.matmul %70, %72, %cst_96 {dimension_numbers = #tpu.dot_dimension_numbers<[1], [0], [0], [1], [0, 0, 1, 1], [], []>} : vector<64x128xf32>, vector<128x128xf32>, vector<64x128xf32> -> vector<64x128xf32>
    %c0_97 = arith.constant 0 : index
    %c0_98 = arith.constant 0 : index
    %74 = vector.load %arg9[%c0_97, %c0_98] : memref<64x128xf32, #tpu.memory_space<vmem>>, vector<64x128xf32>
    %75 = arith.addf %74, %73 : vector<64x128xf32>
    %c0_99 = arith.constant 0 : index
    %c0_100 = arith.constant 0 : index
    %76 = vector.load %arg9[%c0_99, %c0_100] : memref<64x128xf32, #tpu.memory_space<vmem>>, vector<64x128xf32>
    tpu.vector_store %arg9[%c0_99, %c0_100], %75 {strides = array<i32>} : memref<64x128xf32, #tpu.memory_space<vmem>>, vector<64x128xf32>,
    %c0_101 = arith.constant 0 : index
    %c2_102 = arith.constant 2 : index
    %c2_103 = arith.constant 2 : index
    %c0_104 = arith.constant 0 : index
    %77 = vector.load %arg10[%c0_101, %c2_102, %c2_103, %c0_104] : memref<1x10x10x128xf32, #tpu.memory_space<vmem>>, vector<1x8x8x128xf32>
    %78 = vector.shape_cast %77 : vector<1x8x8x128xf32> to vector<64x128xf32>
    %c8 = arith.constant 8 : index
    %c0_105 = arith.constant 0 : index
    %c0_106 = arith.constant 0 : index
    %79 = vector.load %arg3[%c8, %c0_105, %c0_106] : memref<9x128x128xf32, #tpu.memory_space<vmem>>, vector<1x128x128xf32>
    %80 = vector.shape_cast %79 : vector<1x128x128xf32> to vector<128x128xf32>
    %cst_107 = arith.constant dense<0.000000e+00> : vector<64x128xf32>
    %81 = tpu.matmul %78, %80, %cst_107 {dimension_numbers = #tpu.dot_dimension_numbers<[1], [0], [0], [1], [0, 0, 1, 1], [], []>} : vector<64x128xf32>, vector<128x128xf32>, vector<64x128xf32> -> vector<64x128xf32>
    %c0_108 = arith.constant 0 : index
    %c0_109 = arith.constant 0 : index
    %82 = vector.load %arg9[%c0_108, %c0_109] : memref<64x128xf32, #tpu.memory_space<vmem>>, vector<64x128xf32>
    %83 = arith.addf %82, %81 : vector<64x128xf32>
    %c0_110 = arith.constant 0 : index
    %c0_111 = arith.constant 0 : index
    %84 = vector.load %arg9[%c0_110, %c0_111] : memref<64x128xf32, #tpu.memory_space<vmem>>, vector<64x128xf32>
    tpu.vector_store %arg9[%c0_110, %c0_111], %83 {strides = array<i32>} : memref<64x128xf32, #tpu.memory_space<vmem>>, vector<64x128xf32>,
    %c0_112 = arith.constant 0 : index
    %c0_113 = arith.constant 0 : index
    %85 = vector.load %arg9[%c0_112, %c0_113] : memref<64x128xf32, #tpu.memory_space<vmem>>, vector<64x128xf32>
    %c0_114 = arith.constant 0 : index
    %c0_115 = arith.constant 0 : index
    %86 = vector.load %arg6[%c0_114, %c0_115] : memref<64x128xf32, #tpu.memory_space<vmem>>, vector<64x128xf32>
    tpu.vector_store %arg6[%c0_114, %c0_115], %85 {strides = array<i32>} : memref<64x128xf32, #tpu.memory_space<vmem>>, vector<64x128xf32>,
    %cst_116 = arith.constant 0.000000e+00 : f32
    %87 = vector.broadcast %cst_116 : f32 to vector<1x128xf32>
    %cst_117 = arith.constant 0.000000e+00 : f32
    %88 = vector.broadcast %cst_117 : f32 to vector<1x128xf32>
    %c0_118 = arith.constant 0 : index
    %c0_119 = arith.constant 0 : index
    %89 = vector.load %arg9[%c0_118, %c0_119] : memref<64x128xf32, #tpu.memory_space<vmem>>, vector<64x128xf32>
    %cst_120 = arith.constant dense<0.000000e+00> : vector<128xf32>
    %90 = vector.multi_reduction <add>, %89, %cst_120 [0] : vector<64x128xf32> to vector<128xf32>
    %91 = vector.shape_cast %90 : vector<128xf32> to vector<1x128xf32>
    %92 = arith.addf %87, %91 : vector<1x128xf32>
    %93 = arith.mulf %89, %89 : vector<64x128xf32>
    %cst_121 = arith.constant dense<0.000000e+00> : vector<128xf32>
    %94 = vector.multi_reduction <add>, %93, %cst_121 [0] : vector<64x128xf32> to vector<128xf32>
    %95 = vector.shape_cast %94 : vector<128xf32> to vector<1x128xf32>
    %96 = arith.addf %88, %95 : vector<1x128xf32>
    %c0_122 = arith.constant 0 : index
    %c0_123 = arith.constant 0 : index
    %97 = vector.load %arg4[%c0_122, %c0_123] : memref<64x4xf32, #tpu.memory_space<vmem>>, vector<64x4xf32>
    %c0_124 = arith.constant 0 : index
    %c0_125 = arith.constant 0 : index
    %98 = vector.load %arg5[%c0_124, %c0_125] : memref<4x128xf32, #tpu.memory_space<vmem>>, vector<4x128xf32>
    %cst_126 = arith.constant dense<0.000000e+00> : vector<64x128xf32>
    %99 = tpu.matmul %97, %98, %cst_126 {dimension_numbers = #tpu.dot_dimension_numbers<[1], [0], [0], [1], [0, 0, 1, 1], [], []>} : vector<64x4xf32>, vector<4x128xf32>, vector<64x128xf32> -> vector<64x128xf32>
    %c0_127 = arith.constant 0 : index
    %c0_128 = arith.constant 0 : index
    %100 = vector.load %arg9[%c0_127, %c0_128] : memref<64x128xf32, #tpu.memory_space<vmem>>, vector<64x128xf32>
    tpu.vector_store %arg9[%c0_127, %c0_128], %99 {strides = array<i32>} : memref<64x128xf32, #tpu.memory_space<vmem>>, vector<64x128xf32>,
    %c0_129 = arith.constant 0 : index
    %c0_130 = arith.constant 0 : index
    %101 = vector.load %arg9[%c0_129, %c0_130] : memref<64x128xf32, #tpu.memory_space<vmem>>, vector<64x128xf32>
    %c0_131 = arith.constant 0 : index
    %c0_132 = arith.constant 0 : index
    %102 = vector.load %arg7[%c0_131, %c0_132] : memref<64x128xf32, #tpu.memory_space<vmem>>, vector<64x128xf32>
    tpu.vector_store %arg7[%c0_131, %c0_132], %101 {strides = array<i32>} : memref<64x128xf32, #tpu.memory_space<vmem>>, vector<64x128xf32>,
    %cst_133 = arith.constant 0.000000e+00 : f32
    %103 = vector.broadcast %cst_133 : f32 to vector<1x128xf32>
    %cst_134 = arith.constant 0.000000e+00 : f32
    %104 = vector.broadcast %cst_134 : f32 to vector<1x128xf32>
    %c0_135 = arith.constant 0 : index
    %c0_136 = arith.constant 0 : index
    %105 = vector.load %arg9[%c0_135, %c0_136] : memref<64x128xf32, #tpu.memory_space<vmem>>, vector<64x128xf32>
    %cst_137 = arith.constant dense<0.000000e+00> : vector<128xf32>
    %106 = vector.multi_reduction <add>, %105, %cst_137 [0] : vector<64x128xf32> to vector<128xf32>
    %107 = vector.shape_cast %106 : vector<128xf32> to vector<1x128xf32>
    %108 = arith.addf %103, %107 : vector<1x128xf32>
    %109 = arith.mulf %105, %105 : vector<64x128xf32>
    %cst_138 = arith.constant dense<0.000000e+00> : vector<128xf32>
    %110 = vector.multi_reduction <add>, %109, %cst_138 [0] : vector<64x128xf32> to vector<128xf32>
    %111 = vector.shape_cast %110 : vector<128xf32> to vector<1x128xf32>
    %112 = arith.addf %104, %111 : vector<1x128xf32>
    %113 = tpu.concatenate %92, %96, %108, %112 in 0 : vector<1x128xf32>, vector<1x128xf32>, vector<1x128xf32>, vector<1x128xf32> -> vector<4x128xf32>
    %c0_139 = arith.constant 0 : index
    %c0_140 = arith.constant 0 : index
    %c0_141 = arith.constant 0 : index
    %114 = vector.load %arg8[%c0_139, %c0_140, %c0_141] : memref<1x4x128xf32, #tpu.memory_space<vmem>>, vector<1x4x128xf32>
    %115 = vector.shape_cast %114 : vector<1x4x128xf32> to vector<4x128xf32>
    %116 = vector.shape_cast %113 : vector<4x128xf32> to vector<1x4x128xf32>
    tpu.vector_store %arg8[%c0_139, %c0_140, %c0_141], %116 {strides = array<i32>} : memref<1x4x128xf32, #tpu.memory_space<vmem>>, vector<1x4x128xf32>,
    return
  }
  func.func @transform_0(%arg0: i32) -> (i32, i32) {
    %c0_i32 = arith.constant 0 : i32
    %c0_i32_0 = arith.constant 0 : i32
    return %arg0, %c0_i32 : i32, i32
  }
  func.func @transform_1(%arg0: i32) -> (i32, i32) {
    %c0_i32 = arith.constant 0 : i32
    %c0_i32_0 = arith.constant 0 : i32
    %c0_i32_1 = arith.constant 0 : i32
    return %c0_i32, %c0_i32_0 : i32, i32
  }
  func.func @transform_2(%arg0: i32) -> (i32, i32, i32) {
    %c0_i32 = arith.constant 0 : i32
    %c0_i32_0 = arith.constant 0 : i32
    %c0_i32_1 = arith.constant 0 : i32
    %c0_i32_2 = arith.constant 0 : i32
    return %c0_i32, %c0_i32_0, %c0_i32_1 : i32, i32, i32
  }
  func.func @transform_3(%arg0: i32) -> (i32, i32) {
    %c0_i32 = arith.constant 0 : i32
    %c0_i32_0 = arith.constant 0 : i32
    return %arg0, %c0_i32 : i32, i32
  }
  func.func @transform_4(%arg0: i32) -> (i32, i32) {
    %c0_i32 = arith.constant 0 : i32
    %c0_i32_0 = arith.constant 0 : i32
    %c0_i32_1 = arith.constant 0 : i32
    return %c0_i32, %c0_i32_0 : i32, i32
  }
  func.func @transform_5(%arg0: i32) -> (i32, i32) {
    %c0_i32 = arith.constant 0 : i32
    %c0_i32_0 = arith.constant 0 : i32
    return %arg0, %c0_i32 : i32, i32
  }
  func.func @transform_6(%arg0: i32) -> (i32, i32) {
    %c0_i32 = arith.constant 0 : i32
    %c0_i32_0 = arith.constant 0 : i32
    return %arg0, %c0_i32 : i32, i32
  }
  func.func @transform_7(%arg0: i32) -> (i32, i32, i32) {
    %c0_i32 = arith.constant 0 : i32
    %c0_i32_0 = arith.constant 0 : i32
    %c0_i32_1 = arith.constant 0 : i32
    return %arg0, %c0_i32, %c0_i32_0 : i32, i32, i32
  }
}

module attributes {stable_mosaic.version = 11 : i64} {
  func.func @kernel(%arg0: i32, %arg1: memref<64x128xf32, #tpu.memory_space<vmem>>, %arg2: memref<64x128xf32, #tpu.memory_space<vmem>>, %arg3: memref<4x128xf32, #tpu.memory_space<vmem>>, %arg4: memref<64x8xf32, #tpu.memory_space<vmem>>) attributes {dimension_semantics = [#tpu.dimension_semantics<parallel>], iteration_bounds = array<i64: 2>, scalar_prefetch = 0 : i64, scratch_operands = 0 : i64, tpu.core_type = #tpu.core_type<tc>, window_params = [{transform_indices = @transform_0, window_bounds = array<i64: 64, 128>}, {transform_indices = @transform_1, window_bounds = array<i64: 64, 128>}, {pipeline_mode = #tpu.pipeline_mode<synchronous>, transform_indices = @transform_2, window_bounds = array<i64: 4, 128>}, {transform_indices = @transform_3, window_bounds = array<i64: 64, 8>}]} {
    %c0 = arith.constant 0 : index
    %c0_0 = arith.constant 0 : index
    %0 = vector.load %arg1[%c0, %c0_0] : memref<64x128xf32, #tpu.memory_space<vmem>>, vector<64x128xf32>
    %c0_1 = arith.constant 0 : index
    %c0_2 = arith.constant 0 : index
    %1 = vector.load %arg3[%c0_1, %c0_2] : memref<4x128xf32, #tpu.memory_space<vmem>>, vector<1x128xf32>
    %2 = vector.broadcast %1 : vector<1x128xf32> to vector<64x128xf32>
    %3 = arith.mulf %0, %2 : vector<64x128xf32>
    %c1 = arith.constant 1 : index
    %c0_3 = arith.constant 0 : index
    %4 = vector.load %arg3[%c1, %c0_3] : memref<4x128xf32, #tpu.memory_space<vmem>>, vector<1x128xf32>
    %5 = vector.broadcast %4 : vector<1x128xf32> to vector<64x128xf32>
    %6 = arith.addf %3, %5 : vector<64x128xf32>
    %c0_4 = arith.constant 0 : index
    %c0_5 = arith.constant 0 : index
    %7 = vector.load %arg2[%c0_4, %c0_5] : memref<64x128xf32, #tpu.memory_space<vmem>>, vector<64x128xf32>
    %8 = vector.extract_strided_slice %7 {offsets = [0, 0], sizes = [64, 8], strides = [1, 1]} : vector<64x128xf32> to vector<64x8xf32>
    %c2 = arith.constant 2 : index
    %c0_6 = arith.constant 0 : index
    %9 = vector.load %arg3[%c2, %c0_6] : memref<4x128xf32, #tpu.memory_space<vmem>>, vector<1x8xf32>
    %10 = vector.broadcast %9 : vector<1x8xf32> to vector<64x8xf32>
    %11 = arith.mulf %8, %10 : vector<64x8xf32>
    %c3 = arith.constant 3 : index
    %c0_7 = arith.constant 0 : index
    %12 = vector.load %arg3[%c3, %c0_7] : memref<4x128xf32, #tpu.memory_space<vmem>>, vector<1x8xf32>
    %13 = vector.broadcast %12 : vector<1x8xf32> to vector<64x8xf32>
    %14 = arith.addf %11, %13 : vector<64x8xf32>
    %15 = vector.extract_strided_slice %6 {offsets = [0, 0], sizes = [64, 8], strides = [1, 1]} : vector<64x128xf32> to vector<64x8xf32>
    %16 = arith.addf %15, %14 : vector<64x8xf32>
    %cst = arith.constant 0.000000e+00 : f32
    %17 = vector.broadcast %cst : f32 to vector<64x8xf32>
    %18 = arith.maximumf %16, %17 : vector<64x8xf32>
    %c0_8 = arith.constant 0 : index
    %c0_9 = arith.constant 0 : index
    %19 = vector.load %arg4[%c0_8, %c0_9] : memref<64x8xf32, #tpu.memory_space<vmem>>, vector<64x8xf32>
    tpu.vector_store %arg4[%c0_8, %c0_9], %18 {strides = array<i32>} : memref<64x8xf32, #tpu.memory_space<vmem>>, vector<64x8xf32>,
    return
  }
  func.func @transform_0(%arg0: i32) -> (i32, i32) {
    %c0_i32 = arith.constant 0 : i32
    %c0_i32_0 = arith.constant 0 : i32
    return %arg0, %c0_i32 : i32, i32
  }
  func.func @transform_1(%arg0: i32) -> (i32, i32) {
    %c0_i32 = arith.constant 0 : i32
    %c0_i32_0 = arith.constant 0 : i32
    return %arg0, %c0_i32 : i32, i32
  }
  func.func @transform_2(%arg0: i32) -> (i32, i32) {
    %c0_i32 = arith.constant 0 : i32
    %c0_i32_0 = arith.constant 0 : i32
    %c0_i32_1 = arith.constant 0 : i32
    return %c0_i32, %c0_i32_0 : i32, i32
  }
  func.func @transform_3(%arg0: i32) -> (i32, i32) {
    %c0_i32 = arith.constant 0 : i32
    %c0_i32_0 = arith.constant 0 : i32
    return %arg0, %c0_i32 : i32, i32
  }
}

</mosaic_0001>

<bundles_post_ra>
// kernel: basic_block_forward.5
= control target key start
LH: loop header
LB: loop body
LE: loop exit
PB: predicated region body
PF: predicated region fallthrough
CT: control target
= control target key end

     0   :  { %s398_s12 = smov 0   ;;  %s493_s0 = inlined_call_operand.vmem [shape: f32[128,128], index: 0, kind: input, shape index: {}]   ;;  %s494_s1 = inlined_call_operand.vmem [shape: f32[128,128], index: 1, kind: input, shape index: {}]   ;;  %s495_s2 = inlined_call_operand.vmem [shape: f32[4,128], index: 2, kind: input, shape index: {}]   ;;  %s496_s3 = inlined_call_operand.vmem [shape: f32[128,8], index: 3, kind: output, shape index: {}]  }
   0x1 LB: > { %s345_s13 = sadd.s32 4294967295, %s376_s12   ;;  %p349_p0 = scmp.ge.s32.totalorder %s376_s12, 1  ;;  %s376_s12 = sphi %s398_s12, %s13_s12  }
   0x2   : > { %p149_p1 = scmp.lt.s32.totalorder %s376_s12, 3 }
   0x4   : > { %p150_p2 = pnand %p349_p0, %p149_p1 }
   0x5   : > { %s350_s14 = sshll.u32 (!%p150_p2), %s345_s13, 3 }
   0x6   : > { %153 = sbr.rel (%p150_p2) target bundleno = 33 (0x21), region = 32  ;;  %p179_p3 = scmp.lt.s32.totalorder (!%p150_p2), %s350_s14, 15 }
   0xb   : > { %s498_s14 = smov (!%p179_p3, %s350_s14), 15  ;;  %v366_v0 = vld [vmem:[%s495_s2] ss:$0 sm:$0xff]  ;;  %v368_v1 = vld [vmem:[%s495_s2 + $0x2] ss:$0 sm:$0xff]  ;;  %vm268_vm0 = vcmask 64512  }
   0xc   : > { %s412_s19 = sshll.u32 %s498_s14, 3  ;;  %v429_v2 = vld [vmem:[%s495_s2 + $0x1] ss:$0 sm:$0xff]  ;;  %v434_v3 = vld [vmem:[%s495_s2 + $0x3] ss:$0 sm:$0xff] }
   0xd   : > { %s418_s22 = scalar_lea.vmem %s493_s0, %s412_s19  ;;  %s424_s25 = scalar_lea.vmem %s494_s1, %s412_s19 }
   0xe   : > { %v196_v4 = vld [vmem:[%s418_s22] sm:$0xff]  ;;  %v197_v6 = vld [vmem:[%s418_s22 + $0x8] sm:$0xff]  ;;  %v198_v11 = vld [vmem:[%s418_s22 + $0x10] sm:$0xff]  ;;  %s459_s5 = scalar_lea.vmem %s496_s3, %s412_s19 }
   0xf   : > { %v224_v5 = vld [vmem:[%s424_s25] sm:$0xff]  ;;  %v206_v7 = vmul.f32 %v366_v0, %v196_v4  ;;  %v207_v9 = vmul.f32 %v366_v0, %v197_v6  ;;  %v225_v10 = vld [vmem:[%s424_s25 + $0x8] sm:$0xff]  ;;  %v226_v12 = vld [vmem:[%s424_s25 + $0x10] sm:$0xff]  ;;  %v208_v14 = vmul.f32 %v366_v0, %v198_v11 }
  0x10   : > { %v234_v8 = vmul.f32 %v368_v1, %v224_v5  ;;  %v235_v13 = vmul.f32 %v368_v1, %v225_v10  ;;  %v236_v15 = vmul.f32 %v368_v1, %v226_v12  ;;  %v199_v16 = vld [vmem:[%s418_s22 + $0x18] sm:$0xff]  ;;  %v200_v18 = vld [vmem:[%s418_s22 + $0x20] sm:$0xff]  ;;  %v201_v24 = vld [vmem:[%s418_s22 + $0x28] sm:$0xff] }
  0x11   : > { %v227_v17 = vld [vmem:[%s424_s25 + $0x18] sm:$0xff]  ;;  %v216_v19 = vadd.f32 %v429_v2, %v206_v7  ;;  %v217_v21 = vadd.f32 %v429_v2, %v207_v9  ;;  %v209_v22 = vmul.f32 %v366_v0, %v199_v16  ;;  %v228_v23 = vld [vmem:[%s424_s25 + $0x20] sm:$0xff]  ;;  %v218_v26 = vadd.f32 %v429_v2, %v208_v14  ;;  %v229_v29 = vld [vmem:[%s424_s25 + $0x28] sm:$0xff] }
  0x12   : > { %v244_v20 = vadd.f32 %v434_v3, %v234_v8  ;;  %v245_v25 = vadd.f32 %v434_v3, %v235_v13  ;;  %v246_v27 = vadd.f32 %v434_v3, %v236_v15  ;;  %v237_v28 = vmul.f32 %v368_v1, %v227_v17  ;;  %v202_v38 = vld [vmem:[%s418_s22 + $0x30] sm:$0xff]  ;;  %v203_v44 = vld [vmem:[%s418_s22 + $0x38] sm:$0xff] }
  0x13   : > { %v219_v31 = vadd.f32 %v429_v2, %v209_v22  ;;  %v210_v32 = vmul.f32 %v366_v0, %v200_v18  ;;  %v238_v33 = vmul.f32 %v368_v1, %v228_v23  ;;  %v211_v37 = vmul.f32 %v366_v0, %v201_v24  ;;  %v230_v39 = vld [vmem:[%s424_s25 + $0x30] sm:$0xff]  ;;  %v231_v45 = vld [vmem:[%s424_s25 + $0x38] sm:$0xff] }
  0x14   : > { %v252_v30 = vadd.f32 %v244_v20, %v216_v19  ;;  %v253_v34 = vadd.f32 %v245_v25, %v217_v21  ;;  %v254_v35 = vadd.f32 %v246_v27, %v218_v26  ;;  %v247_v36 = vadd.f32 %v434_v3, %v237_v28 }
  0x15   : > { %v220_v41 = vadd.f32 %v429_v2, %v210_v32  ;;  %v248_v42 = vadd.f32 %v434_v3, %v238_v33  ;;  %v239_v43 = vmul.f32 %v368_v1, %v229_v29  ;;  %v221_v49 = vadd.f32 %v429_v2, %v211_v37 }
  0x16   : > { %v260_v40 = vmax.f32 %v252_v30, 0.0  ;;  %v261_v46 = vmax.f32 %v253_v34, 0.0  ;;  %v262_v47 = vmax.f32 %v254_v35, 0.0  ;;  %v255_v48 = vadd.f32 %v247_v36, %v219_v31 }
  0x17   : > { %v256_v50 = vadd.f32 %v248_v42, %v220_v41  ;;  %v249_v51 = vadd.f32 %v434_v3, %v239_v43  ;;  %v212_v52 = vmul.f32 %v366_v0, %v202_v38  ;;  %v240_v53 = vmul.f32 %v368_v1, %v230_v39 }
  0x18   : > { %269 = vst.msk [vmem:[%s459_s5] sm:$0xff] %vm268_vm0, %v260_v40  ;;  %v263_v54 = vmax.f32 %v255_v48, 0.0  ;;  %v213_v55 = vmul.f32 %v366_v0, %v203_v44  ;;  %v241_v56 = vmul.f32 %v368_v1, %v231_v45 }
  0x19   : > { %270 = vst.msk [vmem:[%s459_s5 + $0x8] sm:$0xff] %vm268_vm0, %v261_v46  ;;  %v264_v57 = vmax.f32 %v256_v50, 0.0  ;;  %v257_v58 = vadd.f32 %v249_v51, %v221_v49  ;;  %v222_v59 = vadd.f32 %v429_v2, %v212_v52  ;;  %v250_v60 = vadd.f32 %v434_v3, %v240_v53 }
  0x1a   : > { %271 = vst.msk [vmem:[%s459_s5 + $0x10] sm:$0xff] %vm268_vm0, %v262_v47  ;;  %v223_v61 = vadd.f32 %v429_v2, %v213_v55  ;;  %v251_v62 = vadd.f32 %v434_v3, %v241_v56 }
  0x1b   : > { %272 = vst.msk [vmem:[%s459_s5 + $0x18] sm:$0xff] %vm268_vm0, %v263_v54  ;;  %v265_v63 = vmax.f32 %v257_v58, 0.0  ;;  %v258_v0 = vadd.f32 %v250_v60, %v222_v59 }
  0x1c   : > { %273 = vst.msk [vmem:[%s459_s5 + $0x20] sm:$0xff] %vm268_vm0, %v264_v57  ;;  %v259_v1 = vadd.f32 %v251_v62, %v223_v61 }
  0x1d   : > { %274 = vst.msk [vmem:[%s459_s5 + $0x28] sm:$0xff] %vm268_vm0, %v265_v63  ;;  %v266_v4 = vmax.f32 %v258_v0, 0.0 }
  0x1e   : > { %v267_v5 = vmax.f32 %v259_v1, 0.0 }
  0x1f   : > { %275 = vst.msk [vmem:[%s459_s5 + $0x30] sm:$0xff] %vm268_vm0, %v266_v4 }
  0x20   : > { %276 = vst.msk [vmem:[%s459_s5 + $0x38] sm:$0xff] %vm268_vm0, %v267_v5 }
  0x21 PF: > { %s13_s12 = sadd.s32 1, %s376_s12  }
  0x22   : > { %p10_p4 = scmp.ge.s32.totalorder %s13_s12, 4  }
  0x24   :  { %12 = sbr.rel (!%p10_p4) target bundleno = 1 (0x1), region = 65 }

// kernel: basic_block_forward.3
= control target key start
LH: loop header
LB: loop body
LE: loop exit
PB: predicated region body
PF: predicated region fallthrough
CT: control target
= control target key end

     0   :  { %s1597_s21 = smov 0   ;;  %s1918_s0 = inlined_call_operand.vmem [shape: f32[2,9,9,4], index: 0, kind: input, shape index: {}]   ;;  %s1919_s1 = inlined_call_operand.vmem [shape: f32[2,9,9,4], index: 1, kind: input, shape index: {}]   ;;  %s1920_s2 = inlined_call_operand.vmem [shape: f32[2,9,9,4], index: 2, kind: input, shape index: {}]   ;;  %s1921_s3 = inlined_call_operand.vmem [shape: f32[2,9,9,4], index: 3, kind: input, shape index: {}]   ;;  %s1922_s4 = inlined_call_operand.vmem [shape: f32[9,4,128], index: 4, kind: input, shape index: {}]   ;;  %s1923_s5 = inlined_call_operand.vmem [shape: f32[128,128], index: 5, kind: output, shape index: {0}]   ;;  %s1924_s6 = inlined_call_operand.vmem [shape: f32[2,2,128], index: 6, kind: output, shape index: {1}]  }
   0x1 LB: > { %s1603_s22 = sadd.s32 4294967295, %s1560_s21   ;;  %p1419_p0 = scmp.ge.s32.totalorder %s1560_s21, 1  ;;  %s1560_s21 = sphi %s1597_s21, %s17_s21  }
   0x2   : > { %p245_p1 = scmp.lt.s32.totalorder %s1560_s21, 3 }
   0x4   : > { %p246_p2 = pnand %p1419_p0, %p245_p1 }
   0x5   : > { %p294_p3 = scmp.lt.s32.totalorder (!%p246_p2), %s1603_s22, 1 }
   0x6   : > { %249 = sbr.rel (%p246_p2) target bundleno = 310 (0x136), region = 40 }
   0xb   : > { %v332_v0 = vld [vmem:[%s1922_s4] sm:$0xf]  ;;  %vm358_vm0 = vcmask 1043456   ;;  %v1446_v1 = vld [vmem:[%s1922_s4 + $0x8] sm:$0xf]  ;;  %s1623_s7 = scalar_select %p294_p3, %s1603_s22, 1 }
   0xc   : > { %1542 = vmatpush.msk.msra.mxu1 %vm358_vm0, %v332_v0  ;;  %1543 = vmatpush.msk.msra.mxu2 %vm358_vm0, %v332_v0  ;;  %v1456_v2 = vld [vmem:[%s1922_s4 + $0xc] sm:$0xf]  ;;  %v1436_v3 = vld [vmem:[%s1922_s4 + $0x4] sm:$0xf]  ;;  %v1466_v4 = vld [vmem:[%s1922_s4 + $0x10] sm:$0xf] }
   0xd   : > { %1544 = vmatpush.msk.msra.mxu3 %vm358_vm0, %v332_v0  ;;  %s1633_s10 = smul.u32 144, %s1623_s7  ;;  %1427 = vmatpush.msk.msra.mxu0 %vm358_vm0, %v332_v0  ;;  %vm333_vm1 = vcmask 31744   ;;  %v1494_v5 = vld [vmem:[%s1922_s4 + $0x18] sm:$0xf]  ;;  %v1512_v6 = vld [vmem:[%s1922_s4 + $0x1c] sm:$0xf] }
   0xe   : > { %1447 = vmatpush.msk.msrb.mxu2 %vm358_vm0, %v1446_v1  ;;  %1437 = vmatpush.msk.msrb.mxu1 %vm358_vm0, %v1436_v3  ;;  %v1476_v11 = vld [vmem:[%s1922_s4 + $0x14] sm:$0xf]  ;;  %v1530_v12 = vld [vmem:[%s1922_s4 + $0x20] sm:$0xf]  ;;  %s1426_s14 = sshll.u32 %s1623_s7, 1  ;;  %vm1289_vm2 = vcmask 1040384  }
   0xf   : > { %1457 = vmatpush.msk.msrb.mxu3 %vm358_vm0, %v1456_v2  ;;  %1467 = vmatpush.msk.msrb.mxu0 %vm358_vm0, %v1466_v4  ;;  %s1641_s13 = scalar_lea.vmem %s1918_s0, %s1633_s10  ;;  %s1700_s26 = scalar_lea.vmem %s1919_s1, %s1633_s10 }
  0x10   : > { %v1650_v7 = vld [vmem:[%s1641_s13 + $0x20] sm:$0xff]  ;;  %v1677_v13 = vld [vmem:[%s1641_s13 + $0x30] sm:$0xff]  ;;  %s1706_s29 = scalar_lea.vmem %s1920_s2, %s1633_s10  ;;  %s1712_s9 = scalar_lea.vmem %s1921_s3, %s1633_s10 }
  0x11   : > { %v1653_v8 = vld [vmem:[%s1641_s13 + $0x40] sm:$0xff]  ;;  %1430 = vmatmul.msk.f32.vlgmr.msra.gmra.mxu1 %vm333_vm1, %v1650_v7  ;;  %v1680_v14 = vld [vmem:[%s1641_s13 + $0x50] sm:$0xff]  ;;  %s1424_s10 = sshll.u32 %s1603_s22, 3  ;;  %s323_s17 = scalar_lea.vmem %s1924_s6, %s1426_s14 }
  0x12   : > { %v1656_v9 = vld [vmem:[%s1641_s13 + $0x60] sm:$0xff]  ;;  %1432 = vmatmul.msk.f32.vlgmr.msra.gmra.mxu2 %vm333_vm1, %v1653_v8  ;;  %1477 = vmatpush.msk.msra.mxu1 %vm358_vm0, %v1476_v11  ;;  %v1683_v15 = vld [vmem:[%s1641_s13 + $0x70] sm:$0xff]  ;;  %p315_p4 = scmp.lt.s32.totalorder %s1424_s10, 15 }
  0x13   : > { %v324_v10 = vld [vmem:[%s1641_s13] sm:$0xff]  ;;  %1434 = vmatmul.msk.f32.vlgmr.msra.gmra.mxu3 %vm333_vm1, %v1656_v9  ;;  %1495 = vmatpush.msk.msra.mxu2 %vm358_vm0, %v1494_v5  ;;  %v1686_v16 = vld [vmem:[%s1641_s13 + $0x10] sm:$0xff] }
  0x14   : > { %1428 = vmatmul.msk.f32.vlgmr.msra.gmra.mxu0 %vm333_vm1, %v324_v10  ;;  %1513 = vmatpush.msk.msra.mxu3 %vm358_vm0, %v1512_v6  ;;  %v411_v17 = vld [vmem:[%s1700_s26] sm:$0xff]  ;;  %v412_v21 = vld [vmem:[%s1700_s26 + $0x10] sm:$0xff]  ;;  %s1926_s10 = smov (!%p315_p4, %s1424_s10), 15 }
  0x15   : > { %1531 = vmatpush.msk.msra.mxu0 %vm358_vm0, %v1530_v12  ;;  %v513_v18 = vld [vmem:[%s1641_s13 + $0x1] sm:$0xff]  ;;  %v514_v22 = vld [vmem:[%s1641_s13 + $0x11] sm:$0xff]  ;;  %s1425_s11 = sshll.u32 %s1926_s10, 3 }
  0x16   : > { %v615_v19 = vld [vmem:[%s1706_s29] sm:$0xff]  ;;  %v616_v23 = vld [vmem:[%s1706_s29 + $0x10] sm:$0xff] }
  0x17   : > { %v717_v20 = vld [vmem:[%s1712_s9] sm:$0xff]  ;;  %v718_v24 = vld [vmem:[%s1712_s9 + $0x10] sm:$0xff] }
  0x18   : > { %v413_v25 = vld [vmem:[%s1700_s26 + $0x20] sm:$0xff]  ;;  %v414_v29 = vld [vmem:[%s1700_s26 + $0x30] sm:$0xff] }
  0x19   : > { %1431 = vmatmul.msk.f32.gmra.mxu1 %vm333_vm1, %v1677_v13  ;;  %v515_v26 = vld [vmem:[%s1641_s13 + $0x21] sm:$0xff]  ;;  %v516_v30 = vld [vmem:[%s1641_s13 + $0x31] sm:$0xff] }
  0x1a   : > { %1433 = vmatmul.msk.f32.gmra.mxu2 %vm333_vm1, %v1680_v14  ;;  %v617_v27 = vld [vmem:[%s1706_s29 + $0x20] sm:$0xff]  ;;  %v618_v31 = vld [vmem:[%s1706_s29 + $0x30] sm:$0xff] }
  0x1b   : > { %1435 = vmatmul.msk.f32.gmra.mxu3 %vm333_vm1, %v1683_v15  ;;  %v719_v28 = vld [vmem:[%s1712_s9 + $0x20] sm:$0xff]  ;;  %v720_v32 = vld [vmem:[%s1712_s9 + $0x30] sm:$0xff] }
  0x1c   : > { %1429 = vmatmul.msk.f32.gmra.mxu0 %vm333_vm1, %v1686_v16  ;;  %v415_v33 = vld [vmem:[%s1700_s26 + $0x40] sm:$0xff]  ;;  %v416_v37 = vld [vmem:[%s1700_s26 + $0x50] sm:$0xff] }
  0x1d   : > { %v517_v34 = vld [vmem:[%s1641_s13 + $0x41] sm:$0xff]  ;;  %v518_v38 = vld [vmem:[%s1641_s13 + $0x51] sm:$0xff] }
  0x1e   : > { %v619_v35 = vld [vmem:[%s1706_s29 + $0x40] sm:$0xff]  ;;  %v620_v39 = vld [vmem:[%s1706_s29 + $0x50] sm:$0xff] }
  0x1f   : > { %v721_v36 = vld [vmem:[%s1712_s9 + $0x40] sm:$0xff]  ;;  %v722_v40 = vld [vmem:[%s1712_s9 + $0x50] sm:$0xff] }
  0x20   : > { %v417_v41 = vld [vmem:[%s1700_s26 + $0x60] sm:$0xff]  ;;  %v418_v45 = vld [vmem:[%s1700_s26 + $0x70] sm:$0xff] }
  0x21   : > { %1438 = vmatmul.msk.f32.vlgmr.msrb.gmra.mxu1 %vm333_vm1, %v411_v17  ;;  %v519_v42 = vld [vmem:[%s1641_s13 + $0x61] sm:$0xff]  ;;  %v520_v46 = vld [vmem:[%s1641_s13 + $0x71] sm:$0xff] }
  0x22   : > { %1448 = vmatmul.msk.f32.vlgmr.msrb.gmra.mxu2 %vm333_vm1, %v513_v18  ;;  %v621_v43 = vld [vmem:[%s1706_s29 + $0x60] sm:$0xff]  ;;  %v622_v47 = vld [vmem:[%s1706_s29 + $0x70] sm:$0xff] }
  0x23   : > { %1458 = vmatmul.msk.f32.vlgmr.msrb.gmra.mxu3 %vm333_vm1, %v615_v19  ;;  %v723_v44 = vld [vmem:[%s1712_s9 + $0x60] sm:$0xff]  ;;  %v724_v48 = vld [vmem:[%s1712_s9 + $0x70] sm:$0xff] }
  0x24   : > { %1468 = vmatmul.msk.f32.vlgmr.msrb.gmra.mxu0 %vm333_vm1, %v717_v20  ;;  %v819_v49 = vld [vmem:[%s1706_s29 + $0x1] sm:$0xff]  ;;  %v820_v50 = vld [vmem:[%s1706_s29 + $0x11] sm:$0xff] }
  0x25   : > { %v821_v51 = vld [vmem:[%s1706_s29 + $0x21] sm:$0xff]  ;;  %v822_v52 = vld [vmem:[%s1706_s29 + $0x31] sm:$0xff] }
  0x26   : > { %v823_v53 = vld [vmem:[%s1706_s29 + $0x41] sm:$0xff]  ;;  %v824_v54 = vld [vmem:[%s1706_s29 + $0x51] sm:$0xff] }
  0x27   : > { %v825_v56 = vld [vmem:[%s1706_s29 + $0x61] sm:$0xff]  ;;  %v826_v61 = vld [vmem:[%s1706_s29 + $0x71] sm:$0xff] }
  0x28   : > { %v1493_v62 = vld [vmem:[%s1641_s13 + $0x80] sm:$0xff] }
  0x29   : > { %1439 = vmatmul.msk.f32.gmra.mxu1 %vm333_vm1, %v412_v21  ;;  %v1511_v63 = vld [vmem:[%s1700_s26 + $0x80] sm:$0xff] }
  0x2a   : > { %1449 = vmatmul.msk.f32.gmra.mxu2 %vm333_vm1, %v514_v22  ;;  %v1529_v1 = vld [vmem:[%s1641_s13 + $0x81] sm:$0xff]  ;;  %s1879_s13 = scalar_lea.vmem %s1923_s5, %s1425_s11 }
  0x2b   : > { %1459 = vmatmul.msk.f32.gmra.mxu3 %vm333_vm1, %v616_v23 }
  0x2c   : > { %1469 = vmatmul.msk.f32.gmra.mxu0 %vm333_vm1, %v718_v24 }
  0x31   : > { %1440 = vmatmul.msk.f32.gmra.mxu1 %vm333_vm1, %v413_v25 }
  0x32   : > { %1450 = vmatmul.msk.f32.gmra.mxu2 %vm333_vm1, %v515_v26 }
  0x33   : > { %1460 = vmatmul.msk.f32.gmra.mxu3 %vm333_vm1, %v617_v27 }
  0x34   : > { %1470 = vmatmul.msk.f32.gmra.mxu0 %vm333_vm1, %v719_v28 }
  0x39   : > { %1441 = vmatmul.msk.f32.gmra.mxu1 %vm333_vm1, %v414_v29 }
  0x3a   : > { %1451 = vmatmul.msk.f32.gmra.mxu2 %vm333_vm1, %v516_v30 }
  0x3b   : > { %1461 = vmatmul.msk.f32.gmra.mxu3 %vm333_vm1, %v618_v31 }
  0x3c   : > { %1471 = vmatmul.msk.f32.gmra.mxu0 %vm333_vm1, %v720_v32 }
  0x41   : > { %1442 = vmatmul.msk.f32.gmra.mxu1 %vm333_vm1, %v415_v33 }
  0x42   : > { %1452 = vmatmul.msk.f32.gmra.mxu2 %vm333_vm1, %v517_v34 }
  0x43   : > { %1462 = vmatmul.msk.f32.gmra.mxu3 %vm333_vm1, %v619_v35 }
  0x44   : > { %1472 = vmatmul.msk.f32.gmra.mxu0 %vm333_vm1, %v721_v36 }
  0x49   : > { %1443 = vmatmul.msk.f32.gmra.mxu1 %vm333_vm1, %v416_v37 }
  0x4a   : > { %1453 = vmatmul.msk.f32.gmra.mxu2 %vm333_vm1, %v518_v38 }
  0x4b   : > { %1463 = vmatmul.msk.f32.gmra.mxu3 %vm333_vm1, %v620_v39 }
  0x4c   : > { %1473 = vmatmul.msk.f32.gmra.mxu0 %vm333_vm1, %v722_v40 }
  0x51   : > { %1444 = vmatmul.msk.f32.gmra.mxu1 %vm333_vm1, %v417_v41 }
  0x52   : > { %1454 = vmatmul.msk.f32.gmra.mxu2 %vm333_vm1, %v519_v42 }
  0x53   : > { %1464 = vmatmul.msk.f32.gmra.mxu3 %vm333_vm1, %v621_v43 }
  0x54   : > { %1474 = vmatmul.msk.f32.gmra.mxu0 %vm333_vm1, %v723_v44 }
  0x59   : > { %1445 = vmatmul.msk.f32.gmra.mxu1 %vm333_vm1, %v418_v45 }
  0x5a   : > { %1455 = vmatmul.msk.f32.gmra.mxu2 %vm333_vm1, %v520_v46 }
  0x5b   : > { %1465 = vmatmul.msk.f32.gmra.mxu3 %vm333_vm1, %v622_v47 }
  0x5c   : > { %1475 = vmatmul.msk.f32.gmra.mxu0 %vm333_vm1, %v724_v48 }
  0x61   : > { %1478 = vmatmul.msk.f32.vlgmr.msra.gmra.mxu1 %vm333_vm1, %v819_v49 }
  0x62   : > { %1496 = vmatmul.msk.f32.vlgmr.msra.gmra.mxu2 %vm333_vm1, %v1686_v16 }
  0x63   : > { %1514 = vmatmul.msk.f32.vlgmr.msra.gmra.mxu3 %vm333_vm1, %v412_v21 }
  0x64   : > { %1532 = vmatmul.msk.f32.vlgmr.msra.gmra.mxu0 %vm333_vm1, %v514_v22 }
  0x69   : > { %1479 = vmatmul.msk.f32.gmra.mxu1 %vm333_vm1, %v820_v50 }
  0x6a   : > { %1497 = vmatmul.msk.f32.gmra.mxu2 %vm333_vm1, %v1650_v7 }
  0x6b   : > { %1515 = vmatmul.msk.f32.gmra.mxu3 %vm333_vm1, %v413_v25 }
  0x6c   : > { %1533 = vmatmul.msk.f32.gmra.mxu0 %vm333_vm1, %v515_v26 }
  0x71   : > { %1480 = vmatmul.msk.f32.gmra.mxu1 %vm333_vm1, %v821_v51 }
  0x72   : > { %1498 = vmatmul.msk.f32.gmra.mxu2 %vm333_vm1, %v1677_v13 }
  0x73   : > { %1516 = vmatmul.msk.f32.gmra.mxu3 %vm333_vm1, %v414_v29 }
  0x74   : > { %1534 = vmatmul.msk.f32.gmra.mxu0 %vm333_vm1, %v516_v30 }
  0x79   : > { %1481 = vmatmul.msk.f32.gmra.mxu1 %vm333_vm1, %v822_v52 }
  0x7a   : > { %1499 = vmatmul.msk.f32.gmra.mxu2 %vm333_vm1, %v1653_v8 }
  0x7b   : > { %1517 = vmatmul.msk.f32.gmra.mxu3 %vm333_vm1, %v415_v33 }
  0x7c   : > { %1535 = vmatmul.msk.f32.gmra.mxu0 %vm333_vm1, %v517_v34 }
  0x81   : > { %1482 = vmatmul.msk.f32.gmra.mxu1 %vm333_vm1, %v823_v53 }
  0x82   : > { %1500 = vmatmul.msk.f32.gmra.mxu2 %vm333_vm1, %v1680_v14 }
  0x83   : > { %1518 = vmatmul.msk.f32.gmra.mxu3 %vm333_vm1, %v416_v37 }
  0x84   : > { %1536 = vmatmul.msk.f32.gmra.mxu0 %vm333_vm1, %v518_v38 }
  0x89   : > { %1483 = vmatmul.msk.f32.gmra.mxu1 %vm333_vm1, %v824_v54 }
  0x8a   : > { %1501 = vmatmul.msk.f32.gmra.mxu2 %vm333_vm1, %v1656_v9 }
  0x8b   : > { %1519 = vmatmul.msk.f32.gmra.mxu3 %vm333_vm1, %v417_v41 }
  0x8c   : > { %1537 = vmatmul.msk.f32.gmra.mxu0 %vm333_vm1, %v519_v42 }
  0x8e   : > { %v1814_v55 = vpop.f32.mrf.mxu1 }
  0x91   : > { %v379_v57 = vpop.f32.mrf.mxu0  ;;  %1484 = vmatmul.msk.f32.gmra.mxu1 %vm333_vm1, %v825_v56 }
  0x92   : > { %1502 = vmatmul.msk.f32.gmra.mxu2 %vm333_vm1, %v1683_v15 }
  0x93   : > { %1520 = vmatmul.msk.f32.gmra.mxu3 %vm333_vm1, %v418_v45 }
  0x94   : > { %1538 = vmatmul.msk.f32.gmra.mxu0 %vm333_vm1, %v520_v46 }
  0x95   : > { %v1822_v58 = vpop.f32.mrf.mxu2 }
  0x96   : > { %v1824_v59 = vpop.f32.mrf.mxu3  ;;  %v1826_v60 = vpop.f32.mrf.mxu1 }
  0x99   : > { %v382_v0 = vpop.f32.mrf.mxu0  ;;  %1485 = vmatmul.msk.f32.gmra.mxu1 %vm333_vm1, %v826_v61 }
  0x9a   : > { %1503 = vmatmul.msk.f32.gmra.mxu2 %vm333_vm1, %v1493_v62 }
  0x9b   : > { %1521 = vmatmul.msk.f32.gmra.mxu3 %vm333_vm1, %v1511_v63 }
  0x9c   : > { %1539 = vmatmul.msk.f32.gmra.mxu0 %vm333_vm1, %v1529_v1 }
  0x9d   : > { %v1836_v2 = vpop.f32.mrf.mxu2 }
  0x9e   : > { %v1838_v3 = vpop.f32.mrf.mxu3  ;;  %v465_v4 = vpop.f32.mrf.mxu1 }
  0x9f   : > { %v497_v33 = vadd.f32 %v465_v4, %v379_v57 }
  0xa1   : > { %v771_v5 = vpop.f32.mrf.mxu0 }
  0xa5   : > { %v567_v6 = vpop.f32.mrf.mxu2 }
  0xa6   : > { %v669_v7 = vpop.f32.mrf.mxu3  ;;  %v468_v8 = vpop.f32.mrf.mxu1  ;;  %v599_v35 = vadd.f32 %v567_v6, %v497_v33 }
  0xa7   : > { %v498_v40 = vadd.f32 %v468_v8, %v382_v0 }
  0xa8   : > { %v701_v37 = vadd.f32 %v669_v7, %v599_v35 }
  0xa9   : > { %v774_v9 = vpop.f32.mrf.mxu0 }
  0xaa   : > { %v803_v42 = vadd.f32 %v771_v5, %v701_v37 }
  0xad   : > { %v570_v10 = vpop.f32.mrf.mxu2 }
  0xae   : > { %v672_v11 = vpop.f32.mrf.mxu3  ;;  %v471_v12 = vpop.f32.mrf.mxu1  ;;  %v600_v43 = vadd.f32 %v570_v10, %v498_v40 }
  0xaf   : > { %v499_v50 = vadd.f32 %v471_v12, %v1814_v55 }
  0xb0   : > { %v702_v46 = vadd.f32 %v672_v11, %v600_v43 }
  0xb1   : > { %v777_v13 = vpop.f32.mrf.mxu0 }
  0xb2   : > { %v804_v53 = vadd.f32 %v774_v9, %v702_v46 }
  0xb5   : > { %v573_v14 = vpop.f32.mrf.mxu2 }
  0xb6   : > { %v675_v15 = vpop.f32.mrf.mxu3  ;;  %v474_v16 = vpop.f32.mrf.mxu1  ;;  %v601_v54 = vadd.f32 %v573_v14, %v499_v50 }
  0xb7   : > { %v500_v55 = vadd.f32 %v474_v16, %v1826_v60 }
  0xb8   : > { %v703_v62 = vadd.f32 %v675_v15, %v601_v54 }
  0xb9   : > { %v1840_v17 = vpop.f32.mrf.mxu0 }
  0xba   : > { %v805_v6 = vadd.f32 %v777_v13, %v703_v62 }
  0xbd   : > { %v576_v18 = vpop.f32.mrf.mxu2 }
  0xbe   : > { %v678_v19 = vpop.f32.mrf.mxu3  ;;  %v1842_v20 = vpop.f32.mrf.mxu1  ;;  %v602_v7 = vadd.f32 %v576_v18, %v500_v55 }
  0xbf   : > { %v501_v60 = vadd.f32 %v1842_v20, %v1822_v58 }
  0xc0   : > { %v704_v33 = vadd.f32 %v678_v19, %v602_v7 }
  0xc1   : > { %v1844_v21 = vpop.f32.mrf.mxu0 }
  0xc2   : > { %v806_v13 = vadd.f32 %v1840_v17, %v704_v33 }
  0xc5   : > { %v1846_v22 = vpop.f32.mrf.mxu2 }
  0xc6   : > { %v1848_v23 = vpop.f32.mrf.mxu3  ;;  %v1850_v24 = vpop.f32.mrf.mxu1  ;;  %v603_v18 = vadd.f32 %v1846_v22, %v501_v60 }
  0xc7   : > { %v502_v58 = vadd.f32 %v1850_v24, %v1836_v2 }
  0xc9   : > { %v1852_v25 = vpop.f32.mrf.mxu0 }
  0xcd   : > { %v1854_v26 = vpop.f32.mrf.mxu2 }
  0xce   : > { %v1856_v27 = vpop.f32.mrf.mxu3  ;;  %v1858_v28 = vpop.f32.mrf.mxu1  ;;  %v604_v50 = vadd.f32 %v1854_v26, %v502_v58 }
  0xcf   : > { %v503_v2 = vadd.f32 %v1858_v28, %v1824_v59 }
  0xd1   : > { %v1860_v29 = vpop.f32.mrf.mxu0 }
  0xd5   : > { %v1862_v30 = vpop.f32.mrf.mxu2 }
  0xd6   : > { %v1864_v31 = vpop.f32.mrf.mxu3  ;;  %v1866_v32 = vpop.f32.mrf.mxu1  ;;  %v605_v26 = vadd.f32 %v1862_v30, %v503_v2 }
  0xd7   : > { %v504_v59 = vadd.f32 %v1866_v32, %v1838_v3 }
  0xd9   : > { %v1868_v34 = vpop.f32.mrf.mxu0 }
  0xdd   : > { %v1871_v36 = vpop.f32.mrf.mxu2 }
  0xde   : > { %v1873_v38 = vpop.f32.mrf.mxu3  ;;  %v873_v39 = vpop.f32.mrf.mxu1  ;;  %v606_v30 = vadd.f32 %v1871_v36, %v504_v59 }
  0xdf   : > { %v905_v44 = vadd.f32 %v873_v39, %v803_v42 }
  0xe1   : > { %v1181_v41 = vpop.f32.mrf.mxu0 }
  0xe5   : > { %v976_v45 = vpop.f32.mrf.mxu2 }
  0xe6   : > { %v1008_v47 = vadd.f32 %v976_v45, %v905_v44  ;;  %v1079_v48 = vpop.f32.mrf.mxu3  ;;  %v876_v49 = vpop.f32.mrf.mxu1  ;;  %v705_v45 = vadd.f32 %v1848_v23, %v603_v18 }
  0xe7   : > { %v906_v57 = vadd.f32 %v876_v49, %v804_v53 }
  0xe8   : > { %v1111_v51 = vadd.f32 %v1079_v48, %v1008_v47  ;;  %v807_v22 = vadd.f32 %v1844_v21, %v705_v45 }
  0xe9   : > { %v1184_v52 = vpop.f32.mrf.mxu0 }
  0xea   : > { %v1213_v56 = vadd.f32 %v1181_v41, %v1111_v51 }
  0xec   : > { %1237 = vst [vmem:[%s1879_s13] sm:$0xff] %v1213_v56  ;;  %v1267_v10 = vmul.f32 %v1213_v56, %v1213_v56 }
  0xed   : > { %v979_v61 = vpop.f32.mrf.mxu2 }
  0xee   : > { %v1009_v63 = vadd.f32 %v979_v61, %v906_v57  ;;  %v1082_v0 = vpop.f32.mrf.mxu3  ;;  %v879_v1 = vpop.f32.mrf.mxu1 }
  0xef   : > { %v907_v11 = vadd.f32 %v879_v1, %v805_v6  ;;  %v707_v6 = vadd.f32 %v1864_v31, %v605_v26 }
  0xf0   : > { %v1112_v4 = vadd.f32 %v1082_v0, %v1009_v63 }
  0xf1   : > { %v1187_v5 = vpop.f32.mrf.mxu0  ;;  %v809_v28 = vadd.f32 %v1860_v29, %v707_v6 }
  0xf2   : > { %v1214_v8 = vadd.f32 %v1184_v52, %v1112_v4 }
  0xf4   : > { %1238 = vst [vmem:[%s1879_s13 + $0x8] sm:$0xff] %v1214_v8  ;;  %v1253_v9 = vadd.f32 %v1214_v8, %v1213_v56  ;;  %v1268_v12 = vmul.f32 %v1214_v8, %v1214_v8  ;;  %v706_v56 = vadd.f32 %v1856_v27, %v604_v50 }
  0xf5   : > { %v982_v14 = vpop.f32.mrf.mxu2 }
  0xf6   : > { %v1275_v35 = vadd.f32 %v1268_v12, %v1267_v10  ;;  %v1010_v15 = vadd.f32 %v982_v14, %v907_v11  ;;  %v1085_v37 = vpop.f32.mrf.mxu3  ;;  %v882_v39 = vpop.f32.mrf.mxu1  ;;  %v808_v21 = vadd.f32 %v1852_v25, %v706_v56 }
  0xf7   : > { %v908_v42 = vadd.f32 %v882_v39, %v806_v13 }
  0xf8   : > { %v1113_v16 = vadd.f32 %v1085_v37, %v1010_v15  ;;  %v708_v15 = vadd.f32 %v1873_v38, %v606_v30 }
  0xf9   : > { %v1190_v40 = vpop.f32.mrf.mxu0 }
  0xfa   : > { %v1215_v41 = vadd.f32 %v1187_v5, %v1113_v16  ;;  %v810_v29 = vadd.f32 %v1868_v34, %v708_v15 }
  0xfc   : > { %1239 = vst [vmem:[%s1879_s13 + $0x10] sm:$0xff] %v1215_v41  ;;  %v1254_v43 = vadd.f32 %v1253_v9, %v1215_v41  ;;  %v1269_v44 = vmul.f32 %v1215_v41, %v1215_v41 }
  0xfd   : > { %v985_v19 = vpop.f32.mrf.mxu2 }
  0xfe   : > { %v1276_v46 = vadd.f32 %v1275_v35, %v1269_v44  ;;  %v1011_v47 = vadd.f32 %v985_v19, %v908_v42  ;;  %v1088_v48 = vpop.f32.mrf.mxu3  ;;  %v885_v49 = vpop.f32.mrf.mxu1 }
  0xff   : > { %v909_v52 = vadd.f32 %v885_v49, %v807_v22 }
 0x100   : > { %v1114_v20 = vadd.f32 %v1088_v48, %v1011_v47 }
 0x101   : > { %v1193_v17 = vpop.f32.mrf.mxu0 }
 0x102   : > { %v1216_v51 = vadd.f32 %v1190_v40, %v1114_v20 }
 0x104   : > { %1240 = vst [vmem:[%s1879_s13 + $0x18] sm:$0xff] %v1216_v51  ;;  %v1255_v53 = vadd.f32 %v1254_v43, %v1216_v51  ;;  %v1270_v54 = vmul.f32 %v1216_v51, %v1216_v51 }
 0x105   : > { %v988_v23 = vpop.f32.mrf.mxu2 }
 0x106   : > { %v1277_v57 = vadd.f32 %v1276_v46, %v1270_v54  ;;  %v1012_v61 = vadd.f32 %v988_v23, %v909_v52  ;;  %v1091_v62 = vpop.f32.mrf.mxu3  ;;  %v888_v63 = vpop.f32.mrf.mxu1 }
 0x107   : > { %v910_v55 = vadd.f32 %v888_v63, %v808_v21 }
 0x108   : > { %v1115_v24 = vadd.f32 %v1091_v62, %v1012_v61 }
 0x109   : > { %v1196_v1 = vpop.f32.mrf.mxu0 }
 0x10a   : > { %v1217_v0 = vadd.f32 %v1193_v17, %v1115_v24 }
 0x10c   : > { %1241 = vst [vmem:[%s1879_s13 + $0x20] sm:$0xff] %v1217_v0  ;;  %v1256_v4 = vadd.f32 %v1255_v53, %v1217_v0  ;;  %v1271_v5 = vmul.f32 %v1217_v0, %v1217_v0 }
 0x10d   : > { %v991_v27 = vpop.f32.mrf.mxu2 }
 0x10e   : > { %v1278_v7 = vadd.f32 %v1277_v57, %v1271_v5  ;;  %v1013_v8 = vadd.f32 %v991_v27, %v910_v55  ;;  %v1094_v10 = vpop.f32.mrf.mxu3  ;;  %v891_v11 = vpop.f32.mrf.mxu1 }
 0x10f   : > { %v911_v12 = vadd.f32 %v891_v11, %v809_v28 }
 0x110   : > { %v1116_v25 = vadd.f32 %v1094_v10, %v1013_v8 }
 0x111   : > { %v1199_v31 = vpop.f32.mrf.mxu0 }
 0x112   : > { %v1218_v9 = vadd.f32 %v1196_v1, %v1116_v25 }
 0x114   : > { %1242 = vst [vmem:[%s1879_s13 + $0x28] sm:$0xff] %v1218_v9  ;;  %v1257_v14 = vadd.f32 %v1256_v4, %v1218_v9  ;;  %v1272_v33 = vmul.f32 %v1218_v9, %v1218_v9 }
 0x115   : > { %v994_v35 = vpop.f32.mrf.mxu2 }
 0x116   : > { %v1279_v37 = vadd.f32 %v1278_v7, %v1272_v33  ;;  %v1014_v39 = vadd.f32 %v994_v35, %v911_v12  ;;  %v1097_v60 = vpop.f32.mrf.mxu3  ;;  %v894_v32 = vpop.f32.mrf.mxu1 }
 0x117   : > { %v912_v36 = vadd.f32 %v894_v32, %v810_v29 }
 0x118   : > { %v1117_v3 = vadd.f32 %v1097_v60, %v1014_v39 }
 0x119   : > { %v1202_v44 = vpop.f32.mrf.mxu0 }
 0x11a   : > { %v1219_v16 = vadd.f32 %v1199_v31, %v1117_v3 }
 0x11c   : > { %1243 = vst [vmem:[%s1879_s13 + $0x30] sm:$0xff] %v1219_v16  ;;  %v1258_v40 = vadd.f32 %v1257_v14, %v1219_v16  ;;  %v1273_v13 = vmul.f32 %v1219_v16, %v1219_v16 }
 0x11d   : > { %v997_v18 = vpop.f32.mrf.mxu2 }
 0x11e   : > { %v1280_v41 = vadd.f32 %v1279_v37, %v1273_v13  ;;  %v1015_v42 = vadd.f32 %v997_v18, %v912_v36  ;;  %v1100_v43 = vpop.f32.mrf.mxu3 }
 0x120   : > { %v1118_v38 = vadd.f32 %v1100_v43, %v1015_v42 }
 0x122   : > { %v1220_v19 = vadd.f32 %v1202_v44, %v1118_v38 }
 0x124   : > { %1244 = vst [vmem:[%s1879_s13 + $0x38] sm:$0xff] %v1220_v19  ;;  %v1259_v45 = vadd.f32 %v1258_v40, %v1220_v19  ;;  %v1274_v46 = vmul.f32 %v1220_v19, %v1220_v19 }
 0x126   : > { %v1260_v47 = vrot.slane %v1259_v45, 4  ;;  %v1281_v48 = vadd.f32 %v1280_v41, %v1274_v46 }
 0x128   : > { %v1261_v49 = vadd.f32 %v1260_v47, %v1259_v45  ;;  %v1282_v34 = vrot.slane %v1281_v48, 4 }
 0x12a   : > { %v1262_v58 = vrot.slane %v1261_v49, 2  ;;  %v1283_v20 = vadd.f32 %v1282_v34, %v1281_v48 }
 0x12c   : > { %v1263_v17 = vadd.f32 %v1262_v58, %v1261_v49  ;;  %v1284_v22 = vrot.slane %v1283_v20, 2 }
 0x12e   : > { %v1264_v50 = vrot.slane %v1263_v17, 1  ;;  %v1285_v51 = vadd.f32 %v1284_v22, %v1283_v20 }
 0x130   : > { %v1286_v52 = vrot.slane %v1285_v51, 1  ;;  %v1265_v53 = vadd.f32 %v1264_v50, %v1263_v17 }
 0x132   : > { %v1287_v54 = vadd.f32 %v1286_v52, %v1285_v51 }
 0x134   : > { %v1290_v23 = vsel %vm1289_vm2, %v1265_v53, %v1287_v54 }
 0x135   : > { %1291 = vst [vmem:[%s323_s17] sm:$0x3] %v1290_v23 }
 0x136 PF: > { %s17_s21 = sadd.s32 1, %s1560_s21  }
 0x137   : > { %p14_p5 = scmp.ge.s32.totalorder %s17_s21, 4  }
 0x139   :  { %16 = sbr.rel (!%p14_p5) target bundleno = 1 (0x1), region = 101 }

// kernel: basic_block_forward.4
= control target key start
LH: loop header
LB: loop body
LE: loop exit
PB: predicated region body
PF: predicated region fallthrough
CT: control target
= control target key end

     0   :  { %s1779_s24 = smov 0   ;;  %s2492_s0 = inlined_call_operand.vmem [shape: f32[128,128], index: 0, kind: input, shape index: {}]   ;;  %s2493_s1 = inlined_call_operand.vmem [shape: f32[2,128], index: 1, kind: input, shape index: {}]   ;;  %s2494_s2 = inlined_call_operand.vmem [shape: f32[9,128,128], index: 2, kind: input, shape index: {}]   ;;  %s2495_s3 = inlined_call_operand.vmem [shape: f32[128,4], index: 3, kind: input, shape index: {}]   ;;  %s2496_s4 = inlined_call_operand.vmem [shape: f32[4,128], index: 4, kind: input, shape index: {}]   ;;  %s2497_s5 = inlined_call_operand.vmem [shape: f32[128,128], index: 5, kind: output, shape index: {0}]   ;;  %s2498_s6 = inlined_call_operand.vmem [shape: f32[128,128], index: 6, kind: output, shape index: {1}]   ;;  %s2499_s7 = inlined_call_operand.vmem [shape: f32[2,4,128], index: 7, kind: output, shape index: {2}]  }
   0x1 LB: > { %s1785_s25 = sadd.s32 4294967295, %s1736_s24   ;;  %p1538_p0 = scmp.ge.s32.totalorder %s1736_s24, 1  ;;  %s1736_s24 = sphi %s1779_s24, %s18_s24  }
   0x2   : > { %p254_p1 = scmp.lt.s32.totalorder %s1736_s24, 3 }
   0x4   : > { %p255_p2 = pnand %p1538_p0, %p254_p1 }
   0x5   : > { %s1539_s9 = sshll.u32 (!%p255_p2), %s1785_s25, 3  ;;  %p324_p4 = scmp.lt.s32.totalorder (!%p255_p2), %s1785_s25, 1 }
   0x6   : > { %258 = sbr.rel (%p255_p2) target bundleno = 359 (0x167), region = 40  ;;  %p301_p3 = scmp.lt.s32.totalorder (!%p255_p2), %s1539_s9, 15 }
   0xb   : > { %v416_v0 = vld [vmem:[%s2494_s2 + $0x78] sm:$0xff]  ;;  %v415_v2 = vld [vmem:[%s2494_s2 + $0x70] sm:$0xff]  ;;  %v1738_v4 = vmov 0.0   ;;  %v414_v5 = vld [vmem:[%s2494_s2 + $0x68] sm:$0xff]  ;;  %s2501_s9 = smov (!%p301_p3, %s1539_s9), 15  ;;  %vm1281_vm0 = vcmask 1043456  }
   0xc   : > { %v1563_v1 = vld [vmem:[%s2494_s2 + $0xf8] sm:$0xff]  ;;  %1687 = vmatpush.msra.mxu2 %v416_v0  ;;  %v1562_v3 = vld [vmem:[%s2494_s2 + $0xf0] sm:$0xff]  ;;  %336 = vst [vmem:[#allocation3 + $0x40] sm:$0xff] %v1738_v4  ;;  %v1561_v6 = vld [vmem:[%s2494_s2 + $0xe8] sm:$0xff]  ;;  %417 = vmatpush.msra.mxu0 %v416_v0  ;;  %s1818_s20 = sshll.u32 %s2501_s9, 3  ;;  %vm1256_vm1 = vcmask 31744  }
   0xd   : > { %491 = vmatpush.msra.mxu1 %v1563_v1  ;;  %1703 = vmatpush.msra.mxu3 %v1563_v1  ;;  %337 = vst [vmem:[#allocation3 + $0x48] sm:$0x3] %v1738_v4  ;;  %v413_v7 = vld [vmem:[%s2494_s2 + $0x60] sm:$0xff]  ;;  %v412_v9 = vld [vmem:[%s2494_s2 + $0x58] sm:$0xff]  ;;  %v411_v11 = vld [vmem:[%s2494_s2 + $0x50] sm:$0xff]  ;;  %s1839_s10 = scalar_lea.vmem %s2492_s0, %s1818_s20  ;;  %s2381_s13 = scalar_lea.vmem %s2495_s3, %s1818_s20  ;;  %vm1394_vm2 = vcmask 1040384  }
   0xe   : > { %1688 = vmatpush.msra.mxu2 %v415_v2  ;;  %328 = vst [vmem:[#allocation3] sm:$0xff] %v1738_v4  ;;  %v1560_v8 = vld [vmem:[%s2494_s2 + $0xe0] sm:$0xff]  ;;  %418 = vmatpush.msra.mxu0 %v415_v2  ;;  %v1559_v10 = vld [vmem:[%s2494_s2 + $0xd8] sm:$0xff]  ;;  %v1558_v12 = vld [vmem:[%s2494_s2 + $0xd0] sm:$0xff]  ;;  %s2446_s16 = scalar_lea.vmem %s2498_s6, %s1818_s20  ;;  %s2459_s19 = scalar_lea.vmem %s2497_s5, %s1818_s20  ;;  %vm1396_vm3 = vcmask 1041408   ;;  %vm1398_vm4 = vcmask 1042432  }
   0xf   : > { %492 = vmatpush.msra.mxu1 %v1562_v3  ;;  %1704 = vmatpush.msra.mxu3 %v1562_v3  ;;  %329 = vst [vmem:[#allocation3 + $0x8] sm:$0x3] %v1738_v4  ;;  %v410_v13 = vld [vmem:[%s2494_s2 + $0x48] sm:$0xff]  ;;  %v353_v15 = vld [vmem:[%s1839_s10 + $0x18] sm:$0xff]  ;;  %v1854_v16 = vld [vmem:[%s2493_s1] ss:$0 sm:$0xff] }
  0x10   : > { %1689 = vmatpush.msra.mxu2 %v414_v5  ;;  %330 = vst [vmem:[#allocation3 + $0x10] sm:$0xff] %v1738_v4  ;;  %419 = vmatpush.msra.mxu0 %v414_v5  ;;  %v1557_v14 = vld [vmem:[%s2494_s2 + $0xc8] sm:$0xff]  ;;  %v409_v17 = vld [vmem:[%s2494_s2 + $0x40] sm:$0xff]  ;;  %v362_v20 = vmul.f32 %v1854_v16, %v353_v15  ;;  %v408_v21 = vld [vmem:[%s2494_s2 + $0x38] sm:$0xff]  ;;  %s2503_s25 = smov (!%p324_p4, %s1785_s25), 1 }
  0x11   : > { %493 = vmatpush.msra.mxu1 %v1561_v6  ;;  %1705 = vmatpush.msra.mxu3 %v1561_v6  ;;  %331 = vst [vmem:[#allocation3 + $0x18] sm:$0x3] %v1738_v4  ;;  %v1556_v18 = vld [vmem:[%s2494_s2 + $0xc0] sm:$0xff]  ;;  %v1555_v22 = vld [vmem:[%s2494_s2 + $0xb8] sm:$0xff]  ;;  %v407_v23 = vld [vmem:[%s2494_s2 + $0x30] sm:$0xff]  ;;  %s1547_s20 = sshll.u32 %s2503_s25, 2 }
  0x12   : > { %1690 = vmatpush.msra.mxu2 %v413_v7  ;;  %332 = vst [vmem:[#allocation3 + $0x20] sm:$0xff] %v1738_v4  ;;  %420 = vmatpush.msra.mxu0 %v413_v7  ;;  %v1866_v19 = vld [vmem:[%s2493_s1 + $0x1] ss:$0 sm:$0xff]  ;;  %v1554_v25 = vld [vmem:[%s2494_s2 + $0xb0] sm:$0xff]  ;;  %v406_v31 = vld [vmem:[%s2494_s2 + $0x28] sm:$0xff]  ;;  %s327_s23 = scalar_lea.vmem %s2499_s7, %s1547_s20 }
  0x13   : > { %494 = vmatpush.msra.mxu1 %v1560_v8  ;;  %1706 = vmatpush.msra.mxu3 %v1560_v8  ;;  %333 = vst [vmem:[#allocation3 + $0x28] sm:$0x3] %v1738_v4  ;;  %v371_v24 = vadd.f32 %v1866_v19, %v362_v20  ;;  %v354_v26 = vld [vmem:[%s1839_s10 + $0x20] sm:$0xff]  ;;  %v1553_v32 = vld [vmem:[%s2494_s2 + $0xa8] sm:$0xff]  ;;  %v404_v37 = vld [vmem:[%s2494_s2 + $0x18] sm:$0xff] }
  0x14   : > { %1691 = vmatpush.msra.mxu2 %v412_v9  ;;  %334 = vst [vmem:[#allocation3 + $0x30] sm:$0xff] %v1738_v4  ;;  %421 = vmatpush.msra.mxu0 %v412_v9  ;;  %v350_v27 = vld [vmem:[%s1839_s10] sm:$0xff]  ;;  %v363_v29 = vmul.f32 %v1854_v16, %v354_v26  ;;  %v1551_v39 = vld [vmem:[%s2494_s2 + $0x98] sm:$0xff]  ;;  %v355_v41 = vld [vmem:[%s1839_s10 + $0x28] sm:$0xff] }
  0x15   : > { %495 = vmatpush.msra.mxu1 %v1559_v10  ;;  %1707 = vmatpush.msra.mxu3 %v1559_v10  ;;  %335 = vst [vmem:[#allocation3 + $0x38] sm:$0x3] %v1738_v4  ;;  %v1889_v28 = vmax.f32 %v371_v24, 0.0  ;;  %v359_v30 = vmul.f32 %v1854_v16, %v350_v27  ;;  %v405_v35 = vld [vmem:[%s2494_s2 + $0x20] sm:$0xff]  ;;  %v351_v42 = vld [vmem:[%s1839_s10 + $0x8] sm:$0xff]  ;;  %v364_v43 = vmul.f32 %v1854_v16, %v355_v41  ;;  %v403_v45 = vld [vmem:[%s2494_s2 + $0x10] sm:$0xff] }
  0x16   : > { %1692 = vmatpush.msra.mxu2 %v411_v11  ;;  %338 = vst [vmem:[#allocation3 + $0x50] sm:$0xff] %v1738_v4  ;;  %422 = vmatpush.msra.mxu0 %v411_v11  ;;  %v372_v33 = vadd.f32 %v1866_v19, %v363_v29  ;;  %v1552_v36 = vld [vmem:[%s2494_s2 + $0xa0] sm:$0xff]  ;;  %v360_v44 = vmul.f32 %v1854_v16, %v351_v42  ;;  %v1550_v46 = vld [vmem:[%s2494_s2 + $0x90] sm:$0xff]  ;;  %v402_v49 = vld [vmem:[%s2494_s2 + $0x8] sm:$0xff] }
  0x17   : > { %496 = vmatpush.msra.mxu1 %v1558_v12  ;;  %1708 = vmatpush.msra.mxu3 %v1558_v12  ;;  %339 = vst [vmem:[#allocation3 + $0x58] sm:$0x3] %v1738_v4  ;;  %v368_v34 = vadd.f32 %v1866_v19, %v359_v30  ;;  %v373_v47 = vadd.f32 %v1866_v19, %v364_v43  ;;  %v1549_v50 = vld [vmem:[%s2494_s2 + $0x88] sm:$0xff]  ;;  %v401_v52 = vld [vmem:[%s2494_s2] sm:$0xff]  ;;  %v356_v55 = vld [vmem:[%s1839_s10 + $0x30] sm:$0xff] }
  0x18   : > { %1693 = vmatpush.msra.mxu2 %v410_v13  ;;  %340 = vst [vmem:[#allocation3 + $0x60] sm:$0xff] %v1738_v4  ;;  %423 = vmatpush.msra.mxu0 %v410_v13  ;;  %v1915_v38 = vmax.f32 %v372_v33, 0.0  ;;  %v369_v48 = vadd.f32 %v1866_v19, %v360_v44  ;;  %v1548_v53 = vld [vmem:[%s2494_s2 + $0x80] sm:$0xff]  ;;  %v365_v57 = vmul.f32 %v1854_v16, %v356_v55  ;;  %v352_v58 = vld [vmem:[%s1839_s10 + $0x10] sm:$0xff]  ;;  %v1579_v61 = vld [vmem:[%s2494_s2 + $0x178] sm:$0xff] }
  0x19   : > { %497 = vmatpush.msra.mxu1 %v1557_v14  ;;  %1709 = vmatpush.msra.mxu3 %v1557_v14  ;;  %341 = vst [vmem:[#allocation3 + $0x68] sm:$0x3] %v1738_v4  ;;  %v1920_v40 = vmax.f32 %v368_v34, 0.0  ;;  %v1942_v51 = vmax.f32 %v373_v47, 0.0  ;;  %v466_v59 = vld [vmem:[#allocation3 + $0x1] sm:$0xff]  ;;  %v361_v60 = vmul.f32 %v1854_v16, %v352_v58  ;;  %v1627_v62 = vld [vmem:[%s2494_s2 + $0x2f8] sm:$0xff] }
  0x1a   : > { %1694 = vmatpush.msra.mxu2 %v409_v17  ;;  %342 = vst [vmem:[#allocation3 + $0x70] sm:$0xff] %v1738_v4  ;;  %424 = vmatpush.msra.mxu0 %v409_v17  ;;  %v1950_v54 = vmax.f32 %v369_v48, 0.0  ;;  %v374_v63 = vadd.f32 %v1866_v19, %v365_v57  ;;  %v1595_v0 = vld [vmem:[%s2494_s2 + $0x1f8] sm:$0xff]  ;;  %v1578_v2 = vld [vmem:[%s2494_s2 + $0x170] sm:$0xff]  ;;  %v1577_v8 = vld [vmem:[%s2494_s2 + $0x168] sm:$0xff] }
  0x1b   : > { %498 = vmatpush.msra.mxu1 %v1556_v18  ;;  %1710 = vmatpush.msra.mxu3 %v1556_v18  ;;  %343 = vst [vmem:[#allocation3 + $0x78] sm:$0x3] %v1738_v4  ;;  %v370_v1 = vadd.f32 %v1866_v19, %v361_v60  ;;  %v1626_v3 = vld [vmem:[%s2494_s2 + $0x2f0] sm:$0xff]  ;;  %v1625_v9 = vld [vmem:[%s2494_s2 + $0x2e8] sm:$0xff]  ;;  %v1611_v11 = vld [vmem:[%s2494_s2 + $0x278] sm:$0xff] }
  0x1c   : > { %1695 = vmatpush.msra.mxu2 %v408_v21  ;;  %344 = vst [vmem:[#allocation3 + $0x80] sm:$0xff] %v1738_v4  ;;  %425 = vmatpush.msra.mxu0 %v408_v21  ;;  %v1979_v5 = vmax.f32 %v374_v63, 0.0  ;;  %v1594_v6 = vld [vmem:[%s2494_s2 + $0x1f0] sm:$0xff]  ;;  %v1593_v10 = vld [vmem:[%s2494_s2 + $0x1e8] sm:$0xff]  ;;  %v1576_v12 = vld [vmem:[%s2494_s2 + $0x160] sm:$0xff] }
  0x1d   : > { %499 = vmatpush.msra.mxu1 %v1555_v22  ;;  %1711 = vmatpush.msra.mxu3 %v1555_v22  ;;  %345 = vst [vmem:[#allocation3 + $0x88] sm:$0x3] %v1738_v4  ;;  %v1984_v7 = vmax.f32 %v370_v1, 0.0  ;;  %v1624_v13 = vld [vmem:[%s2494_s2 + $0x2e0] sm:$0xff]  ;;  %v1575_v15 = vld [vmem:[%s2494_s2 + $0x158] sm:$0xff]  ;;  %v1574_v20 = vld [vmem:[%s2494_s2 + $0x150] sm:$0xff] }
  0x1e   : > { %1696 = vmatpush.msra.mxu2 %v407_v23  ;;  %388 = vst [vmem:[#allocation3 + $0x41] sm:$0xff] %v1889_v28  ;;  %426 = vmatpush.msra.mxu0 %v407_v23  ;;  %v1592_v17 = vld [vmem:[%s2494_s2 + $0x1e0] sm:$0xff]  ;;  %v1623_v18 = vld [vmem:[%s2494_s2 + $0x2d8] sm:$0xff]  ;;  %v1610_v21 = vld [vmem:[%s2494_s2 + $0x270] sm:$0xff] }
  0x1f   : > { %500 = vmatpush.msra.mxu1 %v1554_v25  ;;  %1712 = vmatpush.msra.mxu3 %v1554_v25  ;;  %346 = vst [vmem:[#allocation3 + $0x90] sm:$0xff] %v1738_v4  ;;  %v1591_v22 = vld [vmem:[%s2494_s2 + $0x1d8] sm:$0xff]  ;;  %v1622_v23 = vld [vmem:[%s2494_s2 + $0x2d0] sm:$0xff]  ;;  %v1573_v24 = vld [vmem:[%s2494_s2 + $0x148] sm:$0xff] }
  0x20   : > { %1697 = vmatpush.msra.mxu2 %v406_v31  ;;  %347 = vst [vmem:[#allocation3 + $0x98] sm:$0x3] %v1738_v4  ;;  %427 = vmatpush.msra.mxu0 %v406_v31  ;;  %v1609_v25 = vld [vmem:[%s2494_s2 + $0x268] sm:$0xff]  ;;  %v1590_v26 = vld [vmem:[%s2494_s2 + $0x1d0] sm:$0xff]  ;;  %v1572_v29 = vld [vmem:[%s2494_s2 + $0x140] sm:$0xff] }
  0x21   : > { %501 = vmatpush.msra.mxu1 %v1553_v32  ;;  %1713 = vmatpush.msra.mxu3 %v1553_v32  ;;  %389 = vst [vmem:[#allocation3 + $0x51] sm:$0xff] %v1915_v38  ;;  %v1621_v27 = vld [vmem:[%s2494_s2 + $0x2c8] sm:$0xff]  ;;  %v1608_v30 = vld [vmem:[%s2494_s2 + $0x260] sm:$0xff]  ;;  %v1571_v34 = vld [vmem:[%s2494_s2 + $0x138] sm:$0xff] }
  0x22   : > { %1698 = vmatpush.msra.mxu2 %v405_v35  ;;  %428 = vmatpush.msra.mxu0 %v405_v35  ;;  %385 = vst [vmem:[#allocation3 + $0x11] sm:$0xff] %v1920_v40  ;;  %v1589_v31 = vld [vmem:[%s2494_s2 + $0x1c8] sm:$0xff]  ;;  %v1620_v32 = vld [vmem:[%s2494_s2 + $0x2c0] sm:$0xff]  ;;  %v1587_v41 = vld [vmem:[%s2494_s2 + $0x1b8] sm:$0xff] }
  0x23   : > { %502 = vmatpush.msra.mxu1 %v1552_v36  ;;  %1714 = vmatpush.msra.mxu3 %v1552_v36  ;;  %390 = vst [vmem:[#allocation3 + $0x61] sm:$0xff] %v1942_v51  ;;  %v1588_v35 = vld [vmem:[%s2494_s2 + $0x1c0] sm:$0xff]  ;;  %v1619_v36 = vld [vmem:[%s2494_s2 + $0x2b8] sm:$0xff]  ;;  %v1618_v43 = vld [vmem:[%s2494_s2 + $0x2b0] sm:$0xff] }
  0x24   : > { %1699 = vmatpush.msra.mxu2 %v404_v37  ;;  %429 = vmatpush.msra.mxu0 %v404_v37  ;;  %386 = vst [vmem:[#allocation3 + $0x21] sm:$0xff] %v1950_v54  ;;  %v1607_v42 = vld [vmem:[%s2494_s2 + $0x258] sm:$0xff]  ;;  %v1569_v44 = vld [vmem:[%s2494_s2 + $0x128] sm:$0xff]  ;;  %v1568_v48 = vld [vmem:[%s2494_s2 + $0x120] sm:$0xff] }
  0x25   : > { %503 = vmatpush.msra.mxu1 %v1551_v39  ;;  %1715 = vmatpush.msra.mxu3 %v1551_v39  ;;  %v1953_v56 = vld [vmem:[#allocation3 + $0x40] sm:$0xff]  ;;  %391 = vst [vmem:[#allocation3 + $0x71] sm:$0xff] %v1979_v5  ;;  %v1570_v39 = vld [vmem:[%s2494_s2 + $0x130] sm:$0xff]  ;;  %v1617_v47 = vld [vmem:[%s2494_s2 + $0x2a8] sm:$0xff] }
  0x26   : > { %1700 = vmatpush.msra.mxu2 %v403_v45  ;;  %430 = vmatpush.msra.mxu0 %v403_v45  ;;  %387 = vst [vmem:[#allocation3 + $0x31] sm:$0xff] %v1984_v7  ;;  %v1586_v45 = vld [vmem:[%s2494_s2 + $0x1b0] sm:$0xff]  ;;  %v1567_v55 = vld [vmem:[%s2494_s2 + $0x118] sm:$0xff]  ;;  %v1584_v57 = vld [vmem:[%s2494_s2 + $0x1a0] sm:$0xff] }
  0x27   : > { %504 = vmatpush.msra.mxu1 %v1550_v46  ;;  %1716 = vmatpush.msra.mxu3 %v1550_v46  ;;  %v1606_v46 = vld [vmem:[%s2494_s2 + $0x250] sm:$0xff]  ;;  %v1604_v58 = vld [vmem:[%s2494_s2 + $0x240] sm:$0xff]  ;;  %v1603_v63 = vld [vmem:[%s2494_s2 + $0x238] sm:$0xff] }
  0x28   : > { %1701 = vmatpush.msra.mxu2 %v402_v49  ;;  %431 = vmatpush.msra.mxu0 %v402_v49  ;;  %v2007_v14 = vld [vmem:[#allocation3 + $0x50] sm:$0xff]  ;;  %v1585_v49 = vld [vmem:[%s2494_s2 + $0x1a8] sm:$0xff] }
  0x29   : > { %505 = vmatpush.msra.mxu1 %v1549_v50  ;;  %1717 = vmatpush.msra.mxu3 %v1549_v50  ;;  %v2070_v37 = vld [vmem:[#allocation3 + $0x10] sm:$0xff]  ;;  %v1605_v50 = vld [vmem:[%s2494_s2 + $0x248] sm:$0xff] }
  0x2a   : > { %1702 = vmatpush.msra.mxu2 %v401_v52  ;;  %432 = vmatpush.msra.mxu0 %v401_v52  ;;  %v2057_v33 = vld [vmem:[#allocation3 + $0x60] sm:$0xff]  ;;  %v1565_v1 = vld [vmem:[%s2494_s2 + $0x108] sm:$0xff] }
  0x2b   : > { %506 = vmatpush.msra.mxu1 %v1548_v53  ;;  %1718 = vmatpush.msra.mxu3 %v1548_v53  ;;  %v1616_v52 = vld [vmem:[%s2494_s2 + $0x2a0] sm:$0xff] }
  0x2c   : > { %445 = vmatmul.f32.vlgmr.msra.gmra.mxu2 %v1953_v56  ;;  %507 = vmatmul.f32.vlgmr.msra.gmra.mxu1 %v466_v59  ;;  %v2110_v53 = vld [vmem:[#allocation3 + $0x70] sm:$0xff]  ;;  %v1615_v59 = vld [vmem:[%s2494_s2 + $0x298] sm:$0xff]  ;;  %v2127_v60 = vld [vmem:[#allocation3 + $0x20] sm:$0xff] }
  0x2d   : > { %519 = vmatmul.f32.vlgmr.msra.gmra.mxu3 %v1889_v28  ;;  %581 = vmatpush.msrb.mxu2 %v1579_v61  ;;  %v1566_v61 = vld [vmem:[%s2494_s2 + $0x110] sm:$0xff] }
  0x2e   : > { %851 = vmatpush.msrb.mxu1 %v1627_v62  ;;  %671 = vmatpush.msrb.mxu3 %v1595_v0  ;;  %v1583_v62 = vld [vmem:[%s2494_s2 + $0x198] sm:$0xff]  ;;  %v1614_v0 = vld [vmem:[%s2494_s2 + $0x290] sm:$0xff] }
  0x2f   : > { %582 = vmatpush.msrb.mxu2 %v1578_v2  ;;  %433 = vmatmul.f32.vlgmr.msra.gmra.mxu0 %v1738_v4  ;;  %v1582_v2 = vld [vmem:[%s2494_s2 + $0x190] sm:$0xff] }
  0x30   : > { %852 = vmatpush.msrb.mxu1 %v1626_v3  ;;  %672 = vmatpush.msrb.mxu3 %v1594_v6  ;;  %v1602_v3 = vld [vmem:[%s2494_s2 + $0x230] sm:$0xff]  ;;  %v1613_v6 = vld [vmem:[%s2494_s2 + $0x288] sm:$0xff] }
  0x31   : > { %583 = vmatpush.msrb.mxu2 %v1577_v8  ;;  %761 = vmatpush.msrb.mxu0 %v1611_v11  ;;  %v1564_v8 = vld [vmem:[%s2494_s2 + $0x100] sm:$0xff] }
  0x32   : > { %853 = vmatpush.msrb.mxu1 %v1625_v9  ;;  %673 = vmatpush.msrb.mxu3 %v1593_v10  ;;  %v1581_v9 = vld [vmem:[%s2494_s2 + $0x188] sm:$0xff]  ;;  %v1612_v11 = vld [vmem:[%s2494_s2 + $0x280] sm:$0xff] }
  0x33   : > { %584 = vmatpush.msrb.mxu2 %v1576_v12  ;;  %762 = vmatpush.msrb.mxu0 %v1610_v21  ;;  %v1601_v10 = vld [vmem:[%s2494_s2 + $0x228] sm:$0xff]  ;;  %v1599_v21 = vld [vmem:[%s2494_s2 + $0x218] sm:$0xff] }
  0x34   : > { %854 = vmatpush.msrb.mxu1 %v1624_v13  ;;  %448 = vmatmul.f32.gmra.mxu2 %v2007_v14  ;;  %v556_v12 = vld [vmem:[#allocation3 + $0x2] sm:$0xff] }
  0x35   : > { %510 = vmatmul.f32.gmra.mxu1 %v1920_v40  ;;  %522 = vmatmul.f32.gmra.mxu3 %v1915_v38  ;;  %v1580_v13 = vld [vmem:[%s2494_s2 + $0x180] sm:$0xff] }
  0x36   : > { %585 = vmatpush.msrb.mxu2 %v1575_v15  ;;  %674 = vmatpush.msrb.mxu3 %v1592_v17  ;;  %v1600_v15 = vld [vmem:[%s2494_s2 + $0x220] sm:$0xff]  ;;  %v826_v17 = vld [vmem:[#allocation3 + $0x12] sm:$0xff] }
  0x37   : > { %855 = vmatpush.msrb.mxu1 %v1623_v18  ;;  %763 = vmatpush.msrb.mxu0 %v1609_v25  ;;  %v1643_v18 = vld [vmem:[%s2494_s2 + $0x378] sm:$0xff]  ;;  %v1598_v25 = vld [vmem:[%s2494_s2 + $0x210] sm:$0xff] }
  0x38   : > { %586 = vmatpush.msrb.mxu2 %v1574_v20  ;;  %675 = vmatpush.msrb.mxu3 %v1591_v22  ;;  %v2175_v20 = vld [vmem:[#allocation3 + $0x30] sm:$0xff]  ;;  %v1659_v22 = vld [vmem:[%s2494_s2 + $0x3f8] sm:$0xff] }
  0x39   : > { %856 = vmatpush.msrb.mxu1 %v1622_v23  ;;  %764 = vmatpush.msrb.mxu0 %v1608_v30  ;;  %v1642_v23 = vld [vmem:[%s2494_s2 + $0x370] sm:$0xff]  ;;  %v1657_v30 = vld [vmem:[%s2494_s2 + $0x3e8] sm:$0xff] }
  0x3a   : > { %587 = vmatpush.msrb.mxu2 %v1573_v24  ;;  %676 = vmatpush.msrb.mxu3 %v1590_v26  ;;  %v1255_v24 = vld [vmem:[%s2496_s4] sm:$0xf]  ;;  %v1658_v26 = vld [vmem:[%s2494_s2 + $0x3f0] sm:$0xff] }
  0x3b   : > { %857 = vmatpush.msrb.mxu1 %v1621_v27  ;;  %436 = vmatmul.f32.gmra.mxu0 %v2070_v37  ;;  %v1641_v27 = vld [vmem:[%s2494_s2 + $0x368] sm:$0xff] }
  0x3c   : > { %588 = vmatpush.msrb.mxu2 %v1572_v29  ;;  %677 = vmatpush.msrb.mxu3 %v1589_v31  ;;  %v1597_v29 = vld [vmem:[%s2494_s2 + $0x208] sm:$0xff]  ;;  %v1640_v31 = vld [vmem:[%s2494_s2 + $0x360] sm:$0xff] }
  0x3d   : > { %858 = vmatpush.msrb.mxu1 %v1620_v32  ;;  %451 = vmatmul.f32.gmra.mxu2 %v2057_v33  ;;  %v1596_v32 = vld [vmem:[%s2494_s2 + $0x200] sm:$0xff] }
  0x3e   : > { %513 = vmatmul.f32.gmra.mxu1 %v1950_v54  ;;  %525 = vmatmul.f32.gmra.mxu3 %v1942_v51 }
  0x3f   : > { %589 = vmatpush.msrb.mxu2 %v1571_v34  ;;  %678 = vmatpush.msrb.mxu3 %v1588_v35  ;;  %v2212_v34 = vld [vmem:[#allocation3 + $0x22] sm:$0xff]  ;;  %v1675_v35 = vld [vmem:[%s2494_s2 + $0x478] sm:$0xff] }
  0x40   : > { %859 = vmatpush.msrb.mxu1 %v1619_v36  ;;  %765 = vmatpush.msrb.mxu0 %v1607_v42  ;;  %v1656_v36 = vld [vmem:[%s2494_s2 + $0x3e0] sm:$0xff]  ;;  %v1638_v42 = vld [vmem:[%s2494_s2 + $0x350] sm:$0xff] }
  0x41   : > { %590 = vmatpush.msrb.mxu2 %v1570_v39  ;;  %679 = vmatpush.msrb.mxu3 %v1587_v41  ;;  %v1674_v39 = vld [vmem:[%s2494_s2 + $0x470] sm:$0xff]  ;;  %v1655_v41 = vld [vmem:[%s2494_s2 + $0x3d8] sm:$0xff] }
  0x42   : > { %860 = vmatpush.msrb.mxu1 %v1618_v43  ;;  %766 = vmatpush.msrb.mxu0 %v1606_v46  ;;  %v357_v43 = vld [vmem:[%s1839_s10 + $0x38] sm:$0xff]  ;;  %v1637_v46 = vld [vmem:[%s2494_s2 + $0x348] sm:$0xff] }
  0x43   : > { %591 = vmatpush.msrb.mxu2 %v1569_v44  ;;  %680 = vmatpush.msrb.mxu3 %v1586_v45  ;;  %v366_v44 = vmul.f32 %v1854_v16, %v357_v43  ;;  %v1654_v45 = vld [vmem:[%s2494_s2 + $0x3d0] sm:$0xff]  ;;  %v1653_v16 = vld [vmem:[%s2494_s2 + $0x3c8] sm:$0xff] }
  0x44   : > { %861 = vmatpush.msrb.mxu1 %v1617_v47  ;;  %767 = vmatpush.msrb.mxu0 %v1605_v50  ;;  %v2246_v47 = vld [vmem:[#allocation3 + $0x32] sm:$0xff] }
  0x45   : > { %592 = vmatpush.msrb.mxu2 %v1568_v48  ;;  %681 = vmatpush.msrb.mxu3 %v1585_v49  ;;  %v1672_v48 = vld [vmem:[%s2494_s2 + $0x460] sm:$0xff]  ;;  %v375_v49 = vadd.f32 %v1866_v19, %v366_v44  ;;  %v1671_v50 = vld [vmem:[%s2494_s2 + $0x458] sm:$0xff] }
  0x46   : > { %862 = vmatpush.msrb.mxu1 %v1616_v52  ;;  %454 = vmatmul.f32.gmra.mxu2 %v2110_v53  ;;  %v1636_v19 = vld [vmem:[%s2494_s2 + $0x340] sm:$0xff] }
  0x47   : > { %516 = vmatmul.f32.gmra.mxu1 %v1984_v7  ;;  %528 = vmatmul.f32.gmra.mxu3 %v1979_v5  ;;  %v2259_v52 = vmax.f32 %v375_v49, 0.0 }
  0x48   : > { %593 = vmatpush.msrb.mxu2 %v1567_v55  ;;  %682 = vmatpush.msrb.mxu3 %v1584_v57  ;;  %v1652_v55 = vld [vmem:[%s2494_s2 + $0x3c0] sm:$0xff]  ;;  %v1670_v57 = vld [vmem:[%s2494_s2 + $0x450] sm:$0xff] }
  0x49   : > { %768 = vmatpush.msrb.mxu0 %v1604_v58  ;;  %863 = vmatpush.msrb.mxu1 %v1615_v59  ;;  %392 = vst [vmem:[#allocation3 + $0x81] sm:$0xff] %v2259_v52  ;;  %v1635_v58 = vld [vmem:[%s2494_s2 + $0x338] sm:$0xff] }
  0x4a   : > { %439 = vmatmul.f32.gmra.mxu0 %v2127_v60  ;;  %594 = vmatpush.msrb.mxu2 %v1566_v61  ;;  %v1651_v59 = vld [vmem:[%s2494_s2 + $0x3b8] sm:$0xff]  ;;  %v1669_v61 = vld [vmem:[%s2494_s2 + $0x448] sm:$0xff] }
  0x4b   : > { %683 = vmatpush.msrb.mxu3 %v1583_v62  ;;  %769 = vmatpush.msrb.mxu0 %v1603_v63  ;;  %v1634_v62 = vld [vmem:[%s2494_s2 + $0x330] sm:$0xff]  ;;  %v2286_v63 = vld [vmem:[#allocation3 + $0x42] sm:$0xff] }
  0x4c   : > { %864 = vmatpush.msrb.mxu1 %v1614_v0  ;;  %595 = vmatpush.msrb.mxu2 %v1565_v1  ;;  %v1650_v0 = vld [vmem:[%s2494_s2 + $0x3b0] sm:$0xff]  ;;  %v1668_v1 = vld [vmem:[%s2494_s2 + $0x440] sm:$0xff] }
  0x4d   : > { %684 = vmatpush.msrb.mxu3 %v1582_v2  ;;  %770 = vmatpush.msrb.mxu0 %v1602_v3  ;;  %v1633_v2 = vld [vmem:[%s2494_s2 + $0x328] sm:$0xff] }
  0x4e   : > { %865 = vmatpush.msrb.mxu1 %v1613_v6  ;;  %596 = vmatpush.msrb.mxu2 %v1564_v8  ;;  %v1649_v3 = vld [vmem:[%s2494_s2 + $0x3a8] sm:$0xff]  ;;  %v1667_v6 = vld [vmem:[%s2494_s2 + $0x438] sm:$0xff]  ;;  %v1632_v8 = vld [vmem:[%s2494_s2 + $0x320] sm:$0xff] }
  0x4f   : > { %685 = vmatpush.msrb.mxu3 %v1581_v9  ;;  %771 = vmatpush.msrb.mxu0 %v1601_v10  ;;  %v1648_v9 = vld [vmem:[%s2494_s2 + $0x3a0] sm:$0xff]  ;;  %v1666_v10 = vld [vmem:[%s2494_s2 + $0x430] sm:$0xff] }
  0x50   : > { %866 = vmatpush.msrb.mxu1 %v1612_v11  ;;  %597 = vmatmul.f32.vlgmr.msrb.gmra.mxu2 %v556_v12  ;;  %v1631_v11 = vld [vmem:[%s2494_s2 + $0x318] sm:$0xff] }
  0x51   : > { %686 = vmatpush.msrb.mxu3 %v1580_v13  ;;  %772 = vmatpush.msrb.mxu0 %v1600_v15  ;;  %v1647_v12 = vld [vmem:[%s2494_s2 + $0x398] sm:$0xff]  ;;  %v1665_v15 = vld [vmem:[%s2494_s2 + $0x428] sm:$0xff] }
  0x52   : > { %867 = vmatmul.f32.vlgmr.msrb.gmra.mxu1 %v826_v17  ;;  %942 = vmatpush.msra.mxu2 %v1643_v18  ;;  %v2322_v13 = vld [vmem:[#allocation3 + $0x52] sm:$0xff] }
  0x53   : > { %442 = vmatmul.f32.gmra.mxu0 %v2175_v20  ;;  %687 = vmatmul.f32.vlgmr.msrb.gmra.mxu3 %v2070_v37  ;;  %v1639_v37 = vld [vmem:[%s2494_s2 + $0x358] sm:$0xff]  ;;  %v1646_v18 = vld [vmem:[%s2494_s2 + $0x390] sm:$0xff] }
  0x54   : > { %773 = vmatpush.msrb.mxu0 %v1599_v21  ;;  %1032 = vmatpush.msra.mxu3 %v1659_v22  ;;  %v1664_v21 = vld [vmem:[%s2494_s2 + $0x420] sm:$0xff]  ;;  %v1629_v22 = vld [vmem:[%s2494_s2 + $0x308] sm:$0xff] }
  0x55   : > { %943 = vmatpush.msra.mxu2 %v1642_v23  ;;  %1676 = vmatpush.msk.msra.mxu1 %vm1281_vm0, %v1255_v24  ;;  %v1645_v23 = vld [vmem:[%s2494_s2 + $0x388] sm:$0xff]  ;;  %v1663_v24 = vld [vmem:[%s2494_s2 + $0x418] sm:$0xff] }
  0x56   : > { %774 = vmatpush.msrb.mxu0 %v1598_v25  ;;  %1033 = vmatpush.msra.mxu3 %v1658_v26  ;;  %v1644_v25 = vld [vmem:[%s2494_s2 + $0x380] sm:$0xff] }
  0x57   : > { %944 = vmatpush.msra.mxu2 %v1641_v27  ;;  %v1628_v26 = vld [vmem:[%s2494_s2 + $0x300] sm:$0xff]  ;;  %v1662_v27 = vld [vmem:[%s2494_s2 + $0x410] sm:$0xff] }
  0x58   : > { %775 = vmatpush.msrb.mxu0 %v1597_v29  ;;  %600 = vmatmul.f32.gmra.mxu2 %v826_v17  ;;  %v1630_v17 = vld [vmem:[%s2494_s2 + $0x310] sm:$0xff]  ;;  %v2358_v29 = vld [vmem:[#allocation3 + $0x62] sm:$0xff] }
  0x59   : > { %1034 = vmatpush.msra.mxu3 %v1657_v30  ;;  %945 = vmatpush.msra.mxu2 %v1640_v31  ;;  %v1661_v30 = vld [vmem:[%s2494_s2 + $0x408] sm:$0xff]  ;;  %v1660_v31 = vld [vmem:[%s2494_s2 + $0x400] sm:$0xff] }
  0x5a   : > { %776 = vmatpush.msrb.mxu0 %v1596_v32  ;;  %870 = vmatmul.f32.gmra.mxu1 %v2212_v34  ;;  %v832_v32 = vld [vmem:[#allocation3 + $0x72] sm:$0xff] }
  0x5b   : > { %690 = vmatmul.f32.gmra.mxu3 %v2127_v60  ;;  %777 = vmatmul.f32.vlgmr.msrb.gmra.mxu0 %v1920_v40  ;;  %v1673_v40 = vld [vmem:[%s2494_s2 + $0x468] sm:$0xff] }
  0x5c   : > { %1122 = vmatpush.msra.mxu0 %v1675_v35  ;;  %1035 = vmatpush.msra.mxu3 %v1656_v36  ;;  %v2373_v35 = vld [vmem:[#allocation3 + $0x82] sm:$0xff] }
  0x5d   : > { %946 = vmatpush.msra.mxu2 %v1639_v37  ;;  %v653_v36 = vld [vmem:[#allocation3 + $0x80] sm:$0xff] }
  0x5e   : > { %1123 = vmatpush.msra.mxu0 %v1674_v39  ;;  %1036 = vmatpush.msra.mxu3 %v1655_v41  ;;  %v1247_v37 = vld [vmem:[%s2381_s13] sm:$0xff]  ;;  %v1248_v39 = vld [vmem:[%s2381_s13 + $0x8] sm:$0xff]  ;;  %v1249_v41 = vld [vmem:[%s2381_s13 + $0x10] sm:$0xff] }
  0x5f   : > { %947 = vmatpush.msra.mxu2 %v1638_v42 }
  0x60   : > { %603 = vmatmul.f32.gmra.mxu2 %v2212_v34  ;;  %1124 = vmatpush.msra.mxu0 %v1673_v40 }
  0x61   : > { %1037 = vmatpush.msra.mxu3 %v1654_v45  ;;  %948 = vmatpush.msra.mxu2 %v1637_v46 }
  0x62   : > { %873 = vmatmul.f32.gmra.mxu1 %v2246_v47  ;;  %1125 = vmatpush.msra.mxu0 %v1672_v48 }
  0x63   : > { %693 = vmatmul.f32.gmra.mxu3 %v2175_v20  ;;  %780 = vmatmul.f32.gmra.mxu0 %v1950_v54 }
  0x64   : > { %1038 = vmatpush.msra.mxu3 %v1653_v16  ;;  %1126 = vmatpush.msra.mxu0 %v1671_v50  ;;  %v1254_v50 = vld [vmem:[%s2381_s13 + $0x38] sm:$0xff] }
  0x65   : > { %949 = vmatpush.msra.mxu2 %v1636_v19  ;;  %v1014_v19 = vld [vmem:[#allocation3 + $0x91] sm:$0xff] }
  0x66   : > { %1039 = vmatpush.msra.mxu3 %v1652_v55  ;;  %1127 = vmatpush.msra.mxu0 %v1670_v57 }
  0x67   : > { %950 = vmatpush.msra.mxu2 %v1635_v58 }
  0x68   : > { %606 = vmatmul.f32.gmra.mxu2 %v2246_v47  ;;  %1040 = vmatpush.msra.mxu3 %v1651_v59 }
  0x69   : > { %1128 = vmatpush.msra.mxu0 %v1669_v61  ;;  %951 = vmatpush.msra.mxu2 %v1634_v62 }
  0x6a   : > { %876 = vmatmul.f32.gmra.mxu1 %v2286_v63  ;;  %1041 = vmatpush.msra.mxu3 %v1650_v0 }
  0x6b   : > { %696 = vmatmul.f32.gmra.mxu3 %v1953_v56  ;;  %783 = vmatmul.f32.gmra.mxu0 %v1984_v7 }
  0x6c   : > { %1129 = vmatpush.msra.mxu0 %v1668_v1  ;;  %952 = vmatpush.msra.mxu2 %v1633_v2 }
  0x6d   : > { %1042 = vmatpush.msra.mxu3 %v1649_v3 }
  0x6e   : > { %1130 = vmatpush.msra.mxu0 %v1667_v6  ;;  %953 = vmatpush.msra.mxu2 %v1632_v8 }
  0x6f   : > { %1043 = vmatpush.msra.mxu3 %v1648_v9 }
  0x70   : > { %609 = vmatmul.f32.gmra.mxu2 %v2286_v63  ;;  %1131 = vmatpush.msra.mxu0 %v1666_v10 }
  0x71   : > { %954 = vmatpush.msra.mxu2 %v1631_v11  ;;  %1044 = vmatpush.msra.mxu3 %v1647_v12 }
  0x72   : > { %879 = vmatmul.f32.gmra.mxu1 %v2322_v13  ;;  %1132 = vmatpush.msra.mxu0 %v1665_v15 }
  0x73   : > { %699 = vmatmul.f32.gmra.mxu3 %v2007_v14  ;;  %786 = vmatmul.f32.gmra.mxu0 %v1889_v28 }
  0x74   : > { %955 = vmatpush.msra.mxu2 %v1630_v17  ;;  %1045 = vmatpush.msra.mxu3 %v1646_v18 }
  0x75   : > { %1133 = vmatpush.msra.mxu0 %v1664_v21 }
  0x76   : > { %956 = vmatpush.msra.mxu2 %v1629_v22  ;;  %1046 = vmatpush.msra.mxu3 %v1645_v23 }
  0x77   : > { %1134 = vmatpush.msra.mxu0 %v1663_v24 }
  0x78   : > { %612 = vmatmul.f32.gmra.mxu2 %v2322_v13  ;;  %1047 = vmatpush.msra.mxu3 %v1644_v25 }
  0x79   : > { %957 = vmatpush.msra.mxu2 %v1628_v26  ;;  %1135 = vmatpush.msra.mxu0 %v1662_v27 }
  0x7a   : > { %882 = vmatmul.f32.gmra.mxu1 %v2358_v29 }
  0x7b   : > { %702 = vmatmul.f32.gmra.mxu3 %v2057_v33  ;;  %789 = vmatmul.f32.gmra.mxu0 %v1915_v38 }
  0x7c   : > { %1136 = vmatpush.msra.mxu0 %v1661_v30 }
  0x7e   : > { %1137 = vmatpush.msra.mxu0 %v1660_v31 }
  0x80   : > { %615 = vmatmul.f32.gmra.mxu2 %v2358_v29 }
  0x82   : > { %885 = vmatmul.f32.gmra.mxu1 %v832_v32 }
  0x83   : > { %705 = vmatmul.f32.gmra.mxu3 %v2110_v53  ;;  %792 = vmatmul.f32.gmra.mxu0 %v1942_v51 }
  0x88   : > { %618 = vmatmul.f32.gmra.mxu2 %v832_v32 }
  0x8a   : > { %888 = vmatmul.f32.gmra.mxu1 %v2373_v35 }
  0x8b   : > { %708 = vmatmul.f32.gmra.mxu3 %v653_v36  ;;  %795 = vmatmul.f32.gmra.mxu0 %v1979_v5 }
  0x90   : > { %958 = vmatmul.f32.vlgmr.msra.gmra.mxu2 %v2127_v60 }
  0x92   : > { %1677 = vmatmul.msk.f32.vlgmr.msra.gmra.mxu1 %vm1256_vm1, %v1247_v37 }
  0x93   : > { %798 = vmatmul.f32.gmra.mxu0 %v2259_v52  ;;  %1048 = vmatmul.f32.vlgmr.msra.gmra.mxu3 %v1950_v54  ;;  %v1250_v54 = vld [vmem:[%s2381_s13 + $0x18] sm:$0xff] }
  0x98   : > { %961 = vmatmul.f32.gmra.mxu2 %v2175_v20 }
  0x9a   : > { %1678 = vmatmul.msk.f32.gmra.mxu1 %vm1256_vm1, %v1248_v39 }
  0x9b   : > { %1051 = vmatmul.f32.gmra.mxu3 %v1984_v7  ;;  %1138 = vmatmul.f32.vlgmr.msra.gmra.mxu0 %v2212_v34  ;;  %v1251_v34 = vld [vmem:[%s2381_s13 + $0x20] sm:$0xff] }
  0xa0   : > { %964 = vmatmul.f32.gmra.mxu2 %v1953_v56 }
  0xa2   : > { %1679 = vmatmul.msk.f32.gmra.mxu1 %vm1256_vm1, %v1249_v41 }
  0xa3   : > { %1054 = vmatmul.f32.gmra.mxu3 %v1889_v28  ;;  %1141 = vmatmul.f32.gmra.mxu0 %v2246_v47 }
  0xa8   : > { %967 = vmatmul.f32.gmra.mxu2 %v2007_v14 }
  0xa9   : > { %v508_v60 = vpop.f32.mrf.mxu1 }
  0xaa   : > { %1680 = vmatmul.msk.f32.gmra.mxu1 %vm1256_vm1, %v1250_v54 }
  0xab   : > { %1057 = vmatmul.f32.gmra.mxu3 %v1915_v38  ;;  %1144 = vmatmul.f32.gmra.mxu0 %v2286_v63  ;;  %v1252_v38 = vld [vmem:[%s2381_s13 + $0x28] sm:$0xff] }
  0xac   : > { %v434_v7 = vpop.f32.mrf.mxu0 }
  0xad   : > { %v540_v56 = vadd.f32 %v508_v60, %v434_v7 }
  0xaf   : > { %v446_v20 = vpop.f32.mrf.mxu2 }
  0xb0   : > { %v520_v42 = vpop.f32.mrf.mxu3  ;;  %970 = vmatmul.f32.gmra.mxu2 %v2057_v33 }
  0xb1   : > { %v2405_v28 = vadd.f32 %v520_v42, %v446_v20 }
  0xb2   : > { %v511_v43 = vpop.f32.mrf.mxu1  ;;  %1681 = vmatmul.msk.f32.gmra.mxu1 %vm1256_vm1, %v1251_v34 }
  0xb3   : > { %1060 = vmatmul.f32.gmra.mxu3 %v1942_v51  ;;  %1147 = vmatmul.f32.gmra.mxu0 %v2322_v13  ;;  %v1253_v51 = vld [vmem:[%s2381_s13 + $0x30] sm:$0xff] }
  0xb7   : > { %v449_v14 = vpop.f32.mrf.mxu2 }
  0xb8   : > { %973 = vmatmul.f32.gmra.mxu2 %v2110_v53  ;;  %v523_v40 = vpop.f32.mrf.mxu3  ;;  %v437_v45 = vpop.f32.mrf.mxu0 }
  0xb9   : > { %v2412_v44 = vadd.f32 %v523_v40, %v449_v14  ;;  %v541_v46 = vadd.f32 %v511_v43, %v437_v45 }
  0xba   : > { %1682 = vmatmul.msk.f32.gmra.mxu1 %vm1256_vm1, %v1252_v38 }
  0xbb   : > { %1063 = vmatmul.f32.gmra.mxu3 %v1979_v5  ;;  %1150 = vmatmul.f32.gmra.mxu0 %v2358_v29  ;;  %v514_v33 = vpop.f32.mrf.mxu1 }
  0xc0   : > { %976 = vmatmul.f32.gmra.mxu2 %v653_v36  ;;  %v452_v47 = vpop.f32.mrf.mxu2 }
  0xc1   : > { %v526_v48 = vpop.f32.mrf.mxu3 }
  0xc2   : > { %1683 = vmatmul.msk.f32.gmra.mxu1 %vm1256_vm1, %v1253_v51  ;;  %v2419_v53 = vadd.f32 %v526_v48, %v452_v47 }
  0xc3   : > { %1066 = vmatmul.f32.gmra.mxu3 %v2259_v52  ;;  %1153 = vmatmul.f32.gmra.mxu0 %v832_v32  ;;  %v1104_v52 = vld [vmem:[#allocation3 + $0x92] sm:$0xff] }
  0xc4   : > { %v517_v49 = vpop.f32.mrf.mxu1 }
  0xc7   : > { %v440_v16 = vpop.f32.mrf.mxu0 }
  0xc8   : > { %v542_v5 = vadd.f32 %v514_v33, %v440_v16  ;;  %979 = vmatmul.f32.gmra.mxu2 %v1738_v4 }
  0xc9   : > { %v455_v55 = vpop.f32.mrf.mxu2 }
  0xca   : > { %1684 = vmatmul.msk.f32.gmra.mxu1 %vm1256_vm1, %v1254_v50  ;;  %v529_v57 = vpop.f32.mrf.mxu3 }
  0xcb   : > { %1069 = vmatmul.f32.gmra.mxu3 %v1014_v19  ;;  %1156 = vmatmul.f32.gmra.mxu0 %v2373_v35  ;;  %v2426_v58 = vadd.f32 %v529_v57, %v455_v55 }
  0xcf   : > { %v868_v59 = vpop.f32.mrf.mxu1 }
  0xd0   : > { %v443_v61 = vpop.f32.mrf.mxu0 }
  0xd1   : > { %v543_v62 = vadd.f32 %v517_v49, %v443_v61 }
  0xd3   : > { %1159 = vmatmul.f32.gmra.mxu0 %v1104_v52  ;;  %v598_v63 = vpop.f32.mrf.mxu2 }
  0xd4   : > { %v630_v0 = vadd.f32 %v598_v63, %v540_v56 }
  0xd6   : > { %v688_v1 = vpop.f32.mrf.mxu3 }
  0xd7   : > { %v720_v2 = vadd.f32 %v688_v1, %v630_v0  ;;  %v871_v4 = vpop.f32.mrf.mxu1 }
  0xd8   : > { %v778_v3 = vpop.f32.mrf.mxu0 }
  0xd9   : > { %v810_v6 = vadd.f32 %v778_v3, %v720_v2 }
  0xdb   : > { %v601_v8 = vpop.f32.mrf.mxu2  ;;  %v900_v9 = vadd.f32 %v868_v59, %v810_v6 }
  0xdc   : > { %v631_v10 = vadd.f32 %v601_v8, %v541_v46 }
  0xde   : > { %v691_v11 = vpop.f32.mrf.mxu3 }
  0xdf   : > { %v721_v12 = vadd.f32 %v691_v11, %v631_v10  ;;  %v874_v13 = vpop.f32.mrf.mxu1 }
  0xe0   : > { %v781_v15 = vpop.f32.mrf.mxu0 }
  0xe1   : > { %v811_v17 = vadd.f32 %v781_v15, %v721_v12 }
  0xe3   : > { %v604_v18 = vpop.f32.mrf.mxu2  ;;  %v901_v21 = vadd.f32 %v871_v4, %v811_v17 }
  0xe4   : > { %v632_v22 = vadd.f32 %v604_v18, %v542_v5 }
  0xe6   : > { %v694_v23 = vpop.f32.mrf.mxu3 }
  0xe7   : > { %v722_v24 = vadd.f32 %v694_v23, %v632_v22  ;;  %v877_v25 = vpop.f32.mrf.mxu1 }
  0xe8   : > { %v784_v26 = vpop.f32.mrf.mxu0 }
  0xe9   : > { %v812_v27 = vadd.f32 %v784_v26, %v722_v24 }
  0xeb   : > { %v607_v29 = vpop.f32.mrf.mxu2  ;;  %v2428_v30 = vadd.f32 %v874_v13, %v812_v27 }
  0xec   : > { %v633_v31 = vadd.f32 %v607_v29, %v543_v62 }
  0xee   : > { %v697_v32 = vpop.f32.mrf.mxu3 }
  0xef   : > { %v723_v35 = vadd.f32 %v697_v32, %v633_v31  ;;  %v880_v36 = vpop.f32.mrf.mxu1 }
  0xf0   : > { %v787_v37 = vpop.f32.mrf.mxu0 }
  0xf1   : > { %v813_v39 = vadd.f32 %v787_v37, %v723_v35 }
  0xf3   : > { %v610_v41 = vpop.f32.mrf.mxu2  ;;  %v2430_v54 = vadd.f32 %v877_v25, %v813_v39 }
  0xf4   : > { %v634_v60 = vadd.f32 %v610_v41, %v2405_v28 }
  0xf6   : > { %v700_v7 = vpop.f32.mrf.mxu3 }
  0xf7   : > { %v724_v20 = vadd.f32 %v700_v7, %v634_v60  ;;  %v883_v56 = vpop.f32.mrf.mxu1 }
  0xf8   : > { %v790_v34 = vpop.f32.mrf.mxu0 }
  0xf9   : > { %v814_v42 = vadd.f32 %v790_v34, %v724_v20 }
  0xfb   : > { %v613_v43 = vpop.f32.mrf.mxu2  ;;  %v2433_v38 = vadd.f32 %v880_v36, %v814_v42 }
  0xfc   : > { %v635_v14 = vadd.f32 %v613_v43, %v2412_v44 }
  0xfe   : > { %v703_v40 = vpop.f32.mrf.mxu3 }
  0xff   : > { %v725_v33 = vadd.f32 %v703_v40, %v635_v14  ;;  %v886_v45 = vpop.f32.mrf.mxu1 }
 0x100   : > { %v793_v46 = vpop.f32.mrf.mxu0 }
 0x101   : > { %v815_v51 = vadd.f32 %v793_v46, %v725_v33 }
 0x103   : > { %v616_v47 = vpop.f32.mrf.mxu2  ;;  %v2436_v48 = vadd.f32 %v883_v56, %v815_v51 }
 0x104   : > { %v636_v28 = vadd.f32 %v616_v47, %v2419_v53 }
 0x106   : > { %v706_v49 = vpop.f32.mrf.mxu3 }
 0x107   : > { %v726_v16 = vadd.f32 %v706_v49, %v636_v28  ;;  %v889_v50 = vpop.f32.mrf.mxu1 }
 0x108   : > { %v796_v5 = vpop.f32.mrf.mxu0 }
 0x109   : > { %v816_v19 = vadd.f32 %v796_v5, %v726_v16 }
 0x10b   : > { %v619_v55 = vpop.f32.mrf.mxu2  ;;  %v2439_v57 = vadd.f32 %v886_v45, %v816_v19 }
 0x10c   : > { %v637_v44 = vadd.f32 %v619_v55, %v2426_v58 }
 0x10e   : > { %v709_v59 = vpop.f32.mrf.mxu3 }
 0x10f   : > { %v727_v53 = vadd.f32 %v709_v59, %v637_v44  ;;  %v2448_v61 = vpop.f32.mrf.mxu1 }
 0x110   : > { %1342 = vst [vmem:[%s2446_s16] sm:$0xff] %v2448_v61  ;;  %v799_v52 = vpop.f32.mrf.mxu0  ;;  %v1372_v46 = vmul.f32 %v2448_v61, %v2448_v61 }
 0x111   : > { %v817_v62 = vadd.f32 %v799_v52, %v727_v53 }
 0x113   : > { %v959_v63 = vpop.f32.mrf.mxu2  ;;  %v2452_v0 = vadd.f32 %v889_v50, %v817_v62 }
 0x114   : > { %v991_v58 = vadd.f32 %v959_v63, %v900_v9 }
 0x116   : > { %v1049_v1 = vpop.f32.mrf.mxu3 }
 0x117   : > { %v1081_v2 = vadd.f32 %v1049_v1, %v991_v58  ;;  %v1305_v4 = vpop.f32.mrf.mxu1 }
 0x118   : > { %1343 = vst [vmem:[%s2446_s16 + $0x8] sm:$0xff] %v1305_v4  ;;  %v1139_v3 = vpop.f32.mrf.mxu0  ;;  %v1373_v51 = vmul.f32 %v1305_v4, %v1305_v4  ;;  %v1358_v50 = vadd.f32 %v1305_v4, %v2448_v61 }
 0x119   : > { %v1171_v6 = vadd.f32 %v1139_v3, %v1081_v2 }
 0x11a   : > { %v1380_v5 = vadd.f32 %v1373_v51, %v1372_v46 }
 0x11b   : > { %1195 = vst [vmem:[%s2459_s19] sm:$0xff] %v1171_v6  ;;  %v962_v8 = vpop.f32.mrf.mxu2  ;;  %v1225_v17 = vmul.f32 %v1171_v6, %v1171_v6 }
 0x11c   : > { %v992_v10 = vadd.f32 %v962_v8, %v901_v21 }
 0x11e   : > { %v1052_v11 = vpop.f32.mrf.mxu3 }
 0x11f   : > { %v1082_v12 = vadd.f32 %v1052_v11, %v992_v10  ;;  %v1308_v9 = vpop.f32.mrf.mxu1 }
 0x120   : > { %1344 = vst [vmem:[%s2446_s16 + $0x10] sm:$0xff] %v1308_v9  ;;  %v1142_v13 = vpop.f32.mrf.mxu0  ;;  %v1374_v19 = vmul.f32 %v1308_v9, %v1308_v9  ;;  %v1359_v62 = vadd.f32 %v1358_v50, %v1308_v9 }
 0x121   : > { %v1172_v15 = vadd.f32 %v1142_v13, %v1082_v12 }
 0x122   : > { %v1381_v58 = vadd.f32 %v1380_v5, %v1374_v19 }
 0x123   : > { %1196 = vst [vmem:[%s2459_s19 + $0x8] sm:$0xff] %v1172_v15  ;;  %v1211_v18 = vadd.f32 %v1172_v15, %v1171_v6  ;;  %v1226_v22 = vmul.f32 %v1172_v15, %v1172_v15  ;;  %v965_v23 = vpop.f32.mrf.mxu2 }
 0x124   : > { %v993_v24 = vadd.f32 %v965_v23, %v2428_v30 }
 0x125   : > { %v1233_v25 = vadd.f32 %v1226_v22, %v1225_v17 }
 0x126   : > { %v1055_v26 = vpop.f32.mrf.mxu3 }
 0x127   : > { %v1083_v27 = vadd.f32 %v1055_v26, %v993_v24  ;;  %v1311_v21 = vpop.f32.mrf.mxu1 }
 0x128   : > { %1345 = vst [vmem:[%s2446_s16 + $0x18] sm:$0xff] %v1311_v21  ;;  %v1145_v29 = vpop.f32.mrf.mxu0  ;;  %v1375_v59 = vmul.f32 %v1311_v21, %v1311_v21  ;;  %v1360_v3 = vadd.f32 %v1359_v62, %v1311_v21 }
 0x129   : > { %v1173_v31 = vadd.f32 %v1145_v29, %v1083_v27 }
 0x12a   : > { %v1382_v6 = vadd.f32 %v1381_v58, %v1375_v59 }
 0x12b   : > { %1197 = vst [vmem:[%s2459_s19 + $0x10] sm:$0xff] %v1173_v31  ;;  %v1212_v32 = vadd.f32 %v1211_v18, %v1173_v31  ;;  %v1227_v35 = vmul.f32 %v1173_v31, %v1173_v31  ;;  %v968_v36 = vpop.f32.mrf.mxu2 }
 0x12c   : > { %v994_v37 = vadd.f32 %v968_v36, %v2430_v54 }
 0x12d   : > { %v1234_v39 = vadd.f32 %v1233_v25, %v1227_v35 }
 0x12e   : > { %v1058_v41 = vpop.f32.mrf.mxu3 }
 0x12f   : > { %v1084_v60 = vadd.f32 %v1058_v41, %v994_v37  ;;  %v1314_v30 = vpop.f32.mrf.mxu1 }
 0x130   : > { %1346 = vst [vmem:[%s2446_s16 + $0x20] sm:$0xff] %v1314_v30  ;;  %v1148_v7 = vpop.f32.mrf.mxu0  ;;  %v1376_v1 = vmul.f32 %v1314_v30, %v1314_v30  ;;  %v1361_v10 = vadd.f32 %v1360_v3, %v1314_v30 }
 0x131   : > { %v1174_v20 = vadd.f32 %v1148_v7, %v1084_v60 }
 0x132   : > { %v1383_v12 = vadd.f32 %v1382_v6, %v1376_v1 }
 0x133   : > { %1198 = vst [vmem:[%s2459_s19 + $0x18] sm:$0xff] %v1174_v20  ;;  %v1213_v56 = vadd.f32 %v1212_v32, %v1174_v20  ;;  %v1228_v34 = vmul.f32 %v1174_v20, %v1174_v20  ;;  %v971_v42 = vpop.f32.mrf.mxu2 }
 0x134   : > { %v995_v43 = vadd.f32 %v971_v42, %v2433_v38 }
 0x135   : > { %v1235_v14 = vadd.f32 %v1234_v39, %v1228_v34 }
 0x136   : > { %v1061_v40 = vpop.f32.mrf.mxu3 }
 0x137   : > { %v1085_v33 = vadd.f32 %v1061_v40, %v995_v43  ;;  %v1317_v45 = vpop.f32.mrf.mxu1 }
 0x138   : > { %1347 = vst [vmem:[%s2446_s16 + $0x28] sm:$0xff] %v1317_v45  ;;  %v1151_v54 = vpop.f32.mrf.mxu0  ;;  %v1377_v8 = vmul.f32 %v1317_v45, %v1317_v45  ;;  %v1362_v15 = vadd.f32 %v1361_v10, %v1317_v45 }
 0x139   : > { %v1175_v47 = vadd.f32 %v1151_v54, %v1085_v33 }
 0x13a   : > { %v1384_v18 = vadd.f32 %v1383_v12, %v1377_v8 }
 0x13b   : > { %1199 = vst [vmem:[%s2459_s19 + $0x20] sm:$0xff] %v1175_v47  ;;  %v1214_v28 = vadd.f32 %v1213_v56, %v1175_v47  ;;  %v1229_v49 = vmul.f32 %v1175_v47, %v1175_v47  ;;  %v974_v16 = vpop.f32.mrf.mxu2 }
 0x13c   : > { %v996_v38 = vadd.f32 %v974_v16, %v2436_v48 }
 0x13d   : > { %v1236_v55 = vadd.f32 %v1235_v14, %v1229_v49 }
 0x13e   : > { %v1064_v44 = vpop.f32.mrf.mxu3 }
 0x13f   : > { %v1086_v53 = vadd.f32 %v1064_v44, %v996_v38  ;;  %v1320_v52 = vpop.f32.mrf.mxu1 }
 0x140   : > { %1348 = vst [vmem:[%s2446_s16 + $0x30] sm:$0xff] %v1320_v52  ;;  %v1154_v63 = vpop.f32.mrf.mxu0  ;;  %v1378_v13 = vmul.f32 %v1320_v52, %v1320_v52  ;;  %v1363_v24 = vadd.f32 %v1362_v15, %v1320_v52 }
 0x141   : > { %v1176_v2 = vadd.f32 %v1154_v63, %v1086_v53 }
 0x142   : > { %v1385_v27 = vadd.f32 %v1384_v18, %v1378_v13 }
 0x143   : > { %1200 = vst [vmem:[%s2459_s19 + $0x28] sm:$0xff] %v1176_v2  ;;  %v1215_v48 = vadd.f32 %v1214_v28, %v1176_v2  ;;  %v1230_v61 = vmul.f32 %v1176_v2, %v1176_v2  ;;  %v977_v4 = vpop.f32.mrf.mxu2 }
 0x144   : > { %v997_v11 = vadd.f32 %v977_v4, %v2439_v57 }
 0x145   : > { %v1237_v9 = vadd.f32 %v1236_v55, %v1230_v61 }
 0x146   : > { %v1067_v17 = vpop.f32.mrf.mxu3 }
 0x147   : > { %v1087_v22 = vadd.f32 %v1067_v17, %v997_v11  ;;  %v1323_v23 = vpop.f32.mrf.mxu1 }
 0x148   : > { %1349 = vst [vmem:[%s2446_s16 + $0x38] sm:$0xff] %v1323_v23  ;;  %v1379_v25 = vmul.f32 %v1323_v23, %v1323_v23  ;;  %v1157_v26 = vpop.f32.mrf.mxu0  ;;  %v1364_v29 = vadd.f32 %v1363_v24, %v1323_v23 }
 0x149   : > { %v1177_v21 = vadd.f32 %v1157_v26, %v1087_v22 }
 0x14a   : > { %v1386_v31 = vadd.f32 %v1385_v27, %v1379_v25  ;;  %v1365_v39 = vrot.slane %v1364_v29, 4 }
 0x14b   : > { %1201 = vst [vmem:[%s2459_s19 + $0x30] sm:$0xff] %v1177_v21  ;;  %v1216_v57 = vadd.f32 %v1215_v48, %v1177_v21  ;;  %v1231_v32 = vmul.f32 %v1177_v21, %v1177_v21  ;;  %v980_v35 = vpop.f32.mrf.mxu2 }
 0x14c   : > { %v998_v36 = vadd.f32 %v980_v35, %v2452_v0  ;;  %v1387_v60 = vrot.slane %v1386_v31, 4  ;;  %v1366_v56 = vadd.f32 %v1365_v39, %v1364_v29 }
 0x14d   : > { %v1238_v37 = vadd.f32 %v1237_v9, %v1231_v32 }
 0x14e   : > { %v1070_v41 = vpop.f32.mrf.mxu3  ;;  %v1388_v34 = vadd.f32 %v1387_v60, %v1386_v31  ;;  %v1367_v33 = vrot.slane %v1366_v56, 2 }
 0x14f   : > { %v1088_v30 = vadd.f32 %v1070_v41, %v998_v36 }
 0x150   : > { %v1160_v7 = vpop.f32.mrf.mxu0  ;;  %v1389_v45 = vrot.slane %v1388_v34, 2  ;;  %v1368_v47 = vadd.f32 %v1367_v33, %v1366_v56 }
 0x151   : > { %v1178_v20 = vadd.f32 %v1160_v7, %v1088_v30 }
 0x152   : > { %v1390_v28 = vadd.f32 %v1389_v45, %v1388_v34  ;;  %v1369_v5 = vrot.slane %v1368_v47, 1 }
 0x153   : > { %1202 = vst [vmem:[%s2459_s19 + $0x38] sm:$0xff] %v1178_v20  ;;  %v1217_v42 = vadd.f32 %v1216_v57, %v1178_v20  ;;  %v1232_v43 = vmul.f32 %v1178_v20, %v1178_v20 }
 0x154   : > { %v1391_v19 = vrot.slane %v1390_v28, 1  ;;  %v1370_v53 = vadd.f32 %v1369_v5, %v1368_v47 }
 0x155   : > { %v1218_v14 = vrot.slane %v1217_v42, 4  ;;  %v1239_v40 = vadd.f32 %v1238_v37, %v1232_v43 }
 0x156   : > { %v1392_v52 = vadd.f32 %v1391_v19, %v1390_v28 }
 0x157   : > { %v1219_v54 = vadd.f32 %v1218_v14, %v1217_v42  ;;  %v1240_v0 = vrot.slane %v1239_v40, 4 }
 0x159   : > { %v1220_v46 = vrot.slane %v1219_v54, 2  ;;  %v1241_v51 = vadd.f32 %v1240_v0, %v1239_v40 }
 0x15b   : > { %v1221_v49 = vadd.f32 %v1220_v46, %v1219_v54  ;;  %v1242_v16 = vrot.slane %v1241_v51, 2 }
 0x15d   : > { %v1222_v50 = vrot.slane %v1221_v49, 1  ;;  %v1243_v38 = vadd.f32 %v1242_v16, %v1241_v51 }
 0x15f   : > { %v1244_v55 = vrot.slane %v1243_v38, 1  ;;  %v1223_v44 = vadd.f32 %v1222_v50, %v1221_v49 }
 0x161   : > { %v1245_v59 = vadd.f32 %v1244_v55, %v1243_v38 }
 0x163   : > { %v1395_v62 = vsel %vm1394_vm2, %v1223_v44, %v1245_v59 }
 0x164   : > { %v1397_v63 = vsel %vm1396_vm3, %v1395_v62, %v1370_v53 }
 0x165   : > { %v1399_v58 = vsel %vm1398_vm4, %v1397_v63, %v1392_v52 }
 0x166   : > { %1400 = vst [vmem:[%s327_s23] sm:$0xf] %v1399_v58 }
 0x167 PF: > { %s18_s24 = sadd.s32 1, %s1736_s24  }
 0x168   : > { %p15_p5 = scmp.ge.s32.totalorder %s18_s24, 4  }
 0x16a   :  { %17 = sbr.rel (!%p15_p5) target bundleno = 1 (0x1), region = 107 }

</bundles_post_ra>
